<compile_context>
chip_gen: v5e
topology: v5e:2x2
jax: 0.10.0
libtpu: 0.0.40
codegen_flags: <defaults>
</compile_context>

<pallas_src>
import functools

import jax
import jax.numpy as jnp
from jax import lax
from jax.experimental import pallas as pl
from jax.experimental.pallas import tpu as pltpu


def _round_up(x, m):
    return -(-x // m) * m


# ---------------------------------------------------------------------------
# Fused GRU kernel: per grid step (one time-chunk of Tc steps)
#   1) GI = X_chunk @ [Wir|Wiz|Win] + (b_ih + [b_hr, b_hz, 0])   (one MXU matmul)
#   2) sequential recurrence over the Tc steps with only the hidden-side fused
#      (Bp,Hp)x(Hp,3Hp) matmul + gate math per step; h carried in VMEM scratch.
# ---------------------------------------------------------------------------
def _gru_fused_kernel(x_ref, wih_ref, whh_ref, bi_ref, bhn_ref,
                      y_ref, h_ref, gi_ref):
    Tc, Bp, Hp = y_ref.shape

    @pl.when(pl.program_id(0) == 0)
    def _():
        h_ref[...] = jnp.zeros_like(h_ref)

    # Input projection for the whole chunk (gates r|z|n concatenated along lanes).
    # Bias (with b_hr/b_hz folded in) is added once per chunk, not per timestep.
    x2d = x_ref[...].reshape(Tc * Bp, Hp)                     # bf16, layout-free
    gi_ref[...] = (
        jnp.dot(x2d, wih_ref[...], preferred_element_type=jnp.float32)
        + bi_ref[...]
    ).reshape(Tc, Bp, 3 * Hp)

    whh = whh_ref[...]
    bhn = jnp.broadcast_to(bhn_ref[...], (Bp, Hp))            # hoisted broadcast

    def step(t, h_prev):
        gi = gi_ref[t]                                        # (Bp, 3Hp) f32
        gh = jnp.dot(h_prev.astype(whh.dtype), whh,
                     preferred_element_type=jnp.float32)      # (Bp, 3Hp) f32
        r = jax.nn.sigmoid(gi[:, :Hp] + gh[:, :Hp])
        z = jax.nn.sigmoid(gi[:, Hp:2 * Hp] + gh[:, Hp:2 * Hp])
        n = jnp.tanh(gi[:, 2 * Hp:] + r * (gh[:, 2 * Hp:] + bhn))
        h_new = (1.0 - z) * n + z * h_prev
        y_ref[t] = h_new.astype(y_ref.dtype)
        return h_new

    h_last = lax.fori_loop(0, Tc, step, h_ref[...],
                           unroll=Tc if Tc <= 8 else 8)       # bounded unroll
    h_ref[...] = h_last


def _pick_time_chunk(T, Bp, Hp, x_bytes, budget_bytes=20 * 1024 * 1024):
    """Largest Tc whose chunk footprint fits the VMEM budget, then balanced."""
    fixed = 2 * 2 * (Hp * 3 * Hp * x_bytes)             # double-buffered W_ih, W_hh
    per_t = Bp * Hp * (2 * x_bytes + 2 * 4 + 3 * 4)     # x(2 buf) + y f32(2 buf) + gi f32
    tc_max = int(max(1, min(T, (budget_bytes - fixed) // per_t)))
    n_chunks = -(-T // tc_max)
    return -(-T // n_chunks)                             # balance chunk sizes


def _gru_fused_pallas(x, wih_p, whh_p, bi_p, bhn_p, Tc):
    Tp, Bp, Hp = x.shape
    return pl.pallas_call(
        _gru_fused_kernel,
        out_shape=jax.ShapeDtypeStruct((Tp, Bp, Hp), jnp.float32),
        grid=(Tp // Tc,),
        in_specs=[
            pl.BlockSpec((Tc, Bp, Hp), lambda t: (t, 0, 0)),   # streamed x chunk
            pl.BlockSpec((Hp, 3 * Hp), lambda t: (0, 0)),      # resident W_ih
            pl.BlockSpec((Hp, 3 * Hp), lambda t: (0, 0)),      # resident W_hh
            pl.BlockSpec((1, 3 * Hp), lambda t: (0, 0)),       # folded input bias
            pl.BlockSpec((1, Hp), lambda t: (0, 0)),           # b_hn
        ],
        out_specs=pl.BlockSpec((Tc, Bp, Hp), lambda t: (t, 0, 0)),
        scratch_shapes=[
            pltpu.VMEM((Bp, Hp), jnp.float32),             # carried hidden state
            pltpu.VMEM((Tc, Bp, 3 * Hp), jnp.float32),     # per-chunk GI
        ],
        compiler_params=pltpu.CompilerParams(
            dimension_semantics=("arbitrary",),            # sequential time axis
            vmem_limit_bytes=32 * 1024 * 1024),
    )(x, wih_p, whh_p, bi_p, bhn_p)


# ---------------------------------------------------------------------------
# Parameter construction (PyTorch layout) and packing into kernel layout.
# ---------------------------------------------------------------------------
def init_torch_params(key, vocab_size, hidden_size):
    """Raw parameters mirroring nn.Embedding + nn.GRU shapes/layout."""
    H = hidden_size
    k = jax.random.split(key, 5)
    bound = 1.0 / jnp.sqrt(H)
    emb = jax.random.normal(k[0], (vocab_size, H), jnp.float32)
    w_ih = jax.random.uniform(k[1], (3 * H, H), jnp.float32, -bound, bound)
    w_hh = jax.random.uniform(k[2], (3 * H, H), jnp.float32, -bound, bound)
    b_ih = jax.random.uniform(k[3], (3 * H,), jnp.float32, -bound, bound)
    b_hh = jax.random.uniform(k[4], (3 * H,), jnp.float32, -bound, bound)
    return emb, w_ih, w_hh, b_ih, b_hh


def pack_params(emb, w_ih, w_hh, b_ih, b_hh, compute_dtype=jnp.bfloat16):
    """Repack PyTorch-layout params into padded, fused kernel layout.

    Weights are transposed (kernel computes x @ W), r/z/n gate blocks are
    concatenated along the output dim, H is zero-padded to Hp = round_up(H,128)
    (lane-dense tiles; padded hidden lanes provably stay 0), weights/embedding
    are cast to `compute_dtype` (bf16 by default, f32 MXU accumulation).
    b_hr/b_hz are folded into the input-side bias; b_hn stays separate because
    PyTorch multiplies it by r.
    """
    V, H = emb.shape
    Hp = _round_up(H, 128)

    emb_p = jnp.zeros((V, Hp), jnp.float32).at[:, :H].set(emb).astype(compute_dtype)

    def pack_w(w):                                    # (3H, H) -> (Hp, 3*Hp)
        wp = jnp.zeros((Hp, 3 * Hp), jnp.float32)
        for g in range(3):
            wp = wp.at[:H, g * Hp:g * Hp + H].set(w[g * H:(g + 1) * H, :].T)
        return wp.astype(compute_dtype)

    def pack_b(b):                                    # (3H,) -> (1, 3*Hp)
        bp = jnp.zeros((1, 3 * Hp), jnp.float32)
        for g in range(3):
            bp = bp.at[0, g * Hp:g * Hp + H].set(b[g * H:(g + 1) * H])
        return bp

    bhh_p = pack_b(b_hh)
    bi_p = pack_b(b_ih) + bhh_p.at[0, 2 * Hp:].set(0.0)   # fold b_hr, b_hz
    bhn_p = bhh_p[:, 2 * Hp:]                               # (1, Hp)
    return emb_p, pack_w(w_ih), pack_w(w_hh), bi_p, bhn_p


# ---------------------------------------------------------------------------
# Forward pass (== EncoderRNN.forward in eval mode).
# ---------------------------------------------------------------------------
@functools.partial(jax.jit, static_argnums=(2,))
def encoder_rnn_forward(tokens, packed, hidden_size):
    """tokens: (B, T) int32.  Returns (output (B,T,H), hidden (1,B,H))."""
    emb_p, wih_p, whh_p, bi_p, bhn_p = packed
    B, T = tokens.shape
    H = hidden_size
    Hp = whh_p.shape[0]
    sub = 16 if emb_p.dtype == jnp.bfloat16 else 8
    Bp = _round_up(max(B, sub), sub)

    # Embedding lookup gathered directly in time-major (T, B, Hp) layout;
    # eval-mode dropout is the identity.
    x = emb_p[tokens.T]                                  # (T, B, Hp) compute dtype
    if Bp != B:
        x = jnp.pad(x, ((0, 0), (0, Bp - B), (0, 0)))

    Tc = _pick_time_chunk(T, Bp, Hp, x.dtype.itemsize)
    Tp = _round_up(T, Tc)
    if Tp != T:
        x = jnp.pad(x, ((0, Tp - T), (0, 0), (0, 0)))

    # Single fused kernel: per-chunk input projection + sequential recurrence.
    y = _gru_fused_pallas(x, wih_p, whh_p, bi_p, bhn_p, Tc)   # (Tp, Bp, Hp) f32

    # TODO(synk): if the consumer accepts time-major output, drop this transpose.
    output = jnp.transpose(y[:T, :B, :H], (1, 0, 2))      # (B, T, H) batch_first
    hidden = y[T - 1, :B, :H][None]                       # (1, B, H) final state
    return output, hidden


# ---------------------------------------------------------------------------
# Pure-JAX reference (PyTorch GRU equations) for sanity checking.
# ---------------------------------------------------------------------------
def _reference_encoder(tokens, emb, w_ih, w_hh, b_ih, b_hh):
    H = emb.shape[1]
    x = emb[tokens]                                      # (B, T, H)
    B, T, _ = x.shape
    wir, wiz, win = w_ih[:H], w_ih[H:2 * H], w_ih[2 * H:]
    whr, whz, whn = w_hh[:H], w_hh[H:2 * H], w_hh[2 * H:]
    bir, biz, bin_ = b_ih[:H], b_ih[H:2 * H], b_ih[2 * H:]
    bhr, bhz, bhn = b_hh[:H], b_hh[H:2 * H], b_hh[2 * H:]
    h = jnp.zeros((B, H), jnp.float32)
    ys = []
    for t in range(T):
        xt = x[:, t]
        r = jax.nn.sigmoid(xt @ wir.T + bir + h @ whr.T + bhr)
        z = jax.nn.sigmoid(xt @ wiz.T + biz + h @ whz.T + bhz)
        n = jnp.tanh(xt @ win.T + bin_ + r * (h @ whn.T + bhn))
        h = (1.0 - z) * n + z * h
        ys.append(h)
    return jnp.stack(ys, axis=1), h[None]


if __name__ == "__main__":
    key = jax.random.PRNGKey(0)
    vocab_size = 16      # input_size of nn.Embedding
    hidden_size = 32
    batch = 2
    seq_len = 8

    k_param, k_tok = jax.random.split(key)
    emb, w_ih, w_hh, b_ih, b_hh = init_torch_params(k_param, vocab_size, hidden_size)
    packed = pack_params(emb, w_ih, w_hh, b_ih, b_hh, compute_dtype=jnp.bfloat16)
    tokens = jax.random.randint(k_tok, (batch, seq_len), 0, vocab_size, dtype=jnp.int32)

    output, hidden = encoder_rnn_forward(tokens, packed, hidden_size)
    jax.block_until_ready((output, hidden))

    # sanity check against pure-JAX f32 reference (bf16 weights -> loosened tol)
    ref_out, ref_hid = _reference_encoder(tokens, emb, w_ih, w_hh, b_ih, b_hh)
    assert output.shape == (batch, seq_len, hidden_size)
    assert hidden.shape == (1, batch, hidden_size)
    assert jnp.allclose(output, ref_out, atol=2e-2, rtol=2e-2)
    assert jnp.allclose(hidden, ref_hid, atol=2e-2, rtol=2e-2)

    print("KERNEL_OK")
</pallas_src>

<mosaic_0001>
module attributes {stable_mosaic.version = 11 : i64} {
  func.func @_gru_fused_kernel(%arg0: i32, %arg1: memref<8x16x128xbf16, #tpu.memory_space<vmem>>, %arg2: memref<128x384xbf16, #tpu.memory_space<vmem>>, %arg3: memref<128x384xbf16, #tpu.memory_space<vmem>>, %arg4: memref<1x384xf32, #tpu.memory_space<vmem>>, %arg5: memref<1x128xf32, #tpu.memory_space<vmem>>, %arg6: memref<8x16x128xf32, #tpu.memory_space<vmem>>, %arg7: memref<16x128xf32, #tpu.memory_space<vmem>>, %arg8: memref<8x16x384xf32, #tpu.memory_space<vmem>>) attributes {dimension_semantics = [#tpu.dimension_semantics<arbitrary>], iteration_bounds = array<i64: 1>, scalar_prefetch = 0 : i64, scratch_operands = 2 : i64, tpu.core_type = #tpu.core_type<tc>, window_params = [{transform_indices = @transform_0, window_bounds = array<i64: 8, 16, 128>}, {pipeline_mode = #tpu.pipeline_mode<synchronous>, transform_indices = @transform_1, window_bounds = array<i64: 128, 384>}, {pipeline_mode = #tpu.pipeline_mode<synchronous>, transform_indices = @transform_2, window_bounds = array<i64: 128, 384>}, {pipeline_mode = #tpu.pipeline_mode<synchronous>, transform_indices = @transform_3, window_bounds = array<i64: 1, 384>}, {pipeline_mode = #tpu.pipeline_mode<synchronous>, transform_indices = @transform_4, window_bounds = array<i64: 1, 128>}, {transform_indices = @transform_5, window_bounds = array<i64: 8, 16, 128>}]} {
    %c0_i32 = arith.constant 0 : i32
    %0 = arith.cmpi eq, %arg0, %c0_i32 : i32
    %1 = arith.extui %0 : i1 to i32
    %c0_i32_0 = arith.constant 0 : i32
    %2 = arith.cmpi ne, %1, %c0_i32_0 : i32
    scf.if %2 {
      %cst_83 = arith.constant 0.000000e+00 : f32
      %306 = vector.broadcast %cst_83 : f32 to vector<16x128xf32>
      %c0_84 = arith.constant 0 : index
      %c0_85 = arith.constant 0 : index
      %307 = vector.load %arg7[%c0_84, %c0_85] : memref<16x128xf32, #tpu.memory_space<vmem>>, vector<16x128xf32>
      tpu.vector_store %arg7[%c0_84, %c0_85], %306 {strides = array<i32>} : memref<16x128xf32, #tpu.memory_space<vmem>>, vector<16x128xf32>,
    } else {
    }
    %c0 = arith.constant 0 : index
    %c0_1 = arith.constant 0 : index
    %c0_2 = arith.constant 0 : index
    %3 = vector.load %arg1[%c0, %c0_1, %c0_2] : memref<8x16x128xbf16, #tpu.memory_space<vmem>>, vector<8x16x128xbf16>
    %4 = vector.shape_cast %3 : vector<8x16x128xbf16> to vector<128x128xbf16>
    %c0_3 = arith.constant 0 : index
    %c0_4 = arith.constant 0 : index
    %5 = vector.load %arg2[%c0_3, %c0_4] : memref<128x384xbf16, #tpu.memory_space<vmem>>, vector<128x384xbf16>
    %cst = arith.constant dense<0.000000e+00> : vector<128x384xf32>
    %6 = tpu.matmul %4, %5, %cst {dimension_numbers = #tpu.dot_dimension_numbers<[1], [0], [0], [1], [0, 0, 1, 1], [], []>} : vector<128x128xbf16>, vector<128x384xbf16>, vector<128x384xf32> -> vector<128x384xf32>
    %c0_5 = arith.constant 0 : index
    %c0_6 = arith.constant 0 : index
    %7 = vector.load %arg4[%c0_5, %c0_6] : memref<1x384xf32, #tpu.memory_space<vmem>>, vector<1x384xf32>
    %8 = vector.broadcast %7 : vector<1x384xf32> to vector<128x384xf32>
    %9 = arith.addf %6, %8 : vector<128x384xf32>
    %10 = vector.shape_cast %9 : vector<128x384xf32> to vector<8x16x384xf32>
    %c0_7 = arith.constant 0 : index
    %c0_8 = arith.constant 0 : index
    %c0_9 = arith.constant 0 : index
    %11 = vector.load %arg8[%c0_7, %c0_8, %c0_9] : memref<8x16x384xf32, #tpu.memory_space<vmem>>, vector<8x16x384xf32>
    tpu.vector_store %arg8[%c0_7, %c0_8, %c0_9], %10 {strides = array<i32>} : memref<8x16x384xf32, #tpu.memory_space<vmem>>, vector<8x16x384xf32>,
    %c0_10 = arith.constant 0 : index
    %c0_11 = arith.constant 0 : index
    %12 = vector.load %arg3[%c0_10, %c0_11] : memref<128x384xbf16, #tpu.memory_space<vmem>>, vector<128x384xbf16>
    %c0_12 = arith.constant 0 : index
    %c0_13 = arith.constant 0 : index
    %13 = vector.load %arg5[%c0_12, %c0_13] : memref<1x128xf32, #tpu.memory_space<vmem>>, vector<1x128xf32>
    %14 = vector.shape_cast %13 : vector<1x128xf32> to vector<1x128xf32>
    %15 = vector.broadcast %14 : vector<1x128xf32> to vector<16x128xf32>
    %c0_14 = arith.constant 0 : index
    %c0_15 = arith.constant 0 : index
    %16 = vector.load %arg7[%c0_14, %c0_15] : memref<16x128xf32, #tpu.memory_space<vmem>>, vector<16x128xf32>
    %c0_i32_16 = arith.constant 0 : i32
    %17 = arith.index_cast %c0_i32_16 : i32 to index
    %c0_17 = arith.constant 0 : index
    %c0_18 = arith.constant 0 : index
    %18 = vector.load %arg8[%17, %c0_17, %c0_18] : memref<8x16x384xf32, #tpu.memory_space<vmem>>, vector<1x16x384xf32>
    %19 = vector.shape_cast %18 : vector<1x16x384xf32> to vector<16x384xf32>
    %20 = arith.truncf %16 : vector<16x128xf32> to vector<16x128xbf16>
    %cst_19 = arith.constant dense<0.000000e+00> : vector<16x384xf32>
    %21 = tpu.matmul %20, %12, %cst_19 {dimension_numbers = #tpu.dot_dimension_numbers<[1], [0], [0], [1], [0, 0, 1, 1], [], []>} : vector<16x128xbf16>, vector<128x384xbf16>, vector<16x384xf32> -> vector<16x384xf32>
    %22 = vector.extract_strided_slice %19 {offsets = [0, 0], sizes = [16, 128], strides = [1, 1]} : vector<16x384xf32> to vector<16x128xf32>
    %23 = vector.extract_strided_slice %21 {offsets = [0, 0], sizes = [16, 128], strides = [1, 1]} : vector<16x384xf32> to vector<16x128xf32>
    %24 = arith.addf %22, %23 : vector<16x128xf32>
    %25 = arith.negf %24 : vector<16x128xf32>
    %26 = math.exp %25 : vector<16x128xf32>
    %cst_20 = arith.constant 1.000000e+00 : f32
    %27 = vector.broadcast %cst_20 : f32 to vector<16x128xf32>
    %28 = arith.addf %27, %26 : vector<16x128xf32>
    %29 = arith.divf %27, %28 : vector<16x128xf32>
    %30 = vector.extract_strided_slice %19 {offsets = [0, 128], sizes = [16, 128], strides = [1, 1]} : vector<16x384xf32> to vector<16x128xf32>
    %31 = vector.extract_strided_slice %21 {offsets = [0, 128], sizes = [16, 128], strides = [1, 1]} : vector<16x384xf32> to vector<16x128xf32>
    %32 = arith.addf %30, %31 : vector<16x128xf32>
    %33 = arith.negf %32 : vector<16x128xf32>
    %34 = math.exp %33 : vector<16x128xf32>
    %cst_21 = arith.constant 1.000000e+00 : f32
    %35 = vector.broadcast %cst_21 : f32 to vector<16x128xf32>
    %36 = arith.addf %35, %34 : vector<16x128xf32>
    %37 = arith.divf %35, %36 : vector<16x128xf32>
    %38 = vector.extract_strided_slice %19 {offsets = [0, 256], sizes = [16, 128], strides = [1, 1]} : vector<16x384xf32> to vector<16x128xf32>
    %39 = vector.extract_strided_slice %21 {offsets = [0, 256], sizes = [16, 128], strides = [1, 1]} : vector<16x384xf32> to vector<16x128xf32>
    %40 = arith.addf %39, %15 : vector<16x128xf32>
    %41 = arith.mulf %29, %40 : vector<16x128xf32>
    %42 = arith.addf %38, %41 : vector<16x128xf32>
    %43 = math.tanh %42 : vector<16x128xf32>
    %cst_22 = arith.constant 1.000000e+00 : f32
    %44 = vector.broadcast %cst_22 : f32 to vector<16x128xf32>
    %45 = arith.subf %44, %37 : vector<16x128xf32>
    %46 = arith.mulf %45, %43 : vector<16x128xf32>
    %47 = arith.mulf %37, %16 : vector<16x128xf32>
    %48 = arith.addf %46, %47 : vector<16x128xf32>
    %49 = arith.index_cast %c0_i32_16 : i32 to index
    %c0_23 = arith.constant 0 : index
    %c0_24 = arith.constant 0 : index
    %50 = vector.load %arg6[%49, %c0_23, %c0_24] : memref<8x16x128xf32, #tpu.memory_space<vmem>>, vector<1x16x128xf32>
    %51 = vector.shape_cast %50 : vector<1x16x128xf32> to vector<16x128xf32>
    %52 = vector.shape_cast %48 : vector<16x128xf32> to vector<1x16x128xf32>
    tpu.vector_store %arg6[%49, %c0_23, %c0_24], %52 {strides = array<i32>} : memref<8x16x128xf32, #tpu.memory_space<vmem>>, vector<1x16x128xf32>,
    %c1_i32 = arith.constant 1 : i32
    %53 = arith.index_cast %c1_i32 : i32 to index
    %c0_25 = arith.constant 0 : index
    %c0_26 = arith.constant 0 : index
    %54 = vector.load %arg8[%53, %c0_25, %c0_26] : memref<8x16x384xf32, #tpu.memory_space<vmem>>, vector<1x16x384xf32>
    %55 = vector.shape_cast %54 : vector<1x16x384xf32> to vector<16x384xf32>
    %56 = arith.truncf %48 : vector<16x128xf32> to vector<16x128xbf16>
    %cst_27 = arith.constant dense<0.000000e+00> : vector<16x384xf32>
    %57 = tpu.matmul %56, %12, %cst_27 {dimension_numbers = #tpu.dot_dimension_numbers<[1], [0], [0], [1], [0, 0, 1, 1], [], []>} : vector<16x128xbf16>, vector<128x384xbf16>, vector<16x384xf32> -> vector<16x384xf32>
    %58 = vector.extract_strided_slice %55 {offsets = [0, 0], sizes = [16, 128], strides = [1, 1]} : vector<16x384xf32> to vector<16x128xf32>
    %59 = vector.extract_strided_slice %57 {offsets = [0, 0], sizes = [16, 128], strides = [1, 1]} : vector<16x384xf32> to vector<16x128xf32>
    %60 = arith.addf %58, %59 : vector<16x128xf32>
    %61 = arith.negf %60 : vector<16x128xf32>
    %62 = math.exp %61 : vector<16x128xf32>
    %cst_28 = arith.constant 1.000000e+00 : f32
    %63 = vector.broadcast %cst_28 : f32 to vector<16x128xf32>
    %64 = arith.addf %63, %62 : vector<16x128xf32>
    %65 = arith.divf %63, %64 : vector<16x128xf32>
    %66 = vector.extract_strided_slice %55 {offsets = [0, 128], sizes = [16, 128], strides = [1, 1]} : vector<16x384xf32> to vector<16x128xf32>
    %67 = vector.extract_strided_slice %57 {offsets = [0, 128], sizes = [16, 128], strides = [1, 1]} : vector<16x384xf32> to vector<16x128xf32>
    %68 = arith.addf %66, %67 : vector<16x128xf32>
    %69 = arith.negf %68 : vector<16x128xf32>
    %70 = math.exp %69 : vector<16x128xf32>
    %cst_29 = arith.constant 1.000000e+00 : f32
    %71 = vector.broadcast %cst_29 : f32 to vector<16x128xf32>
    %72 = arith.addf %71, %70 : vector<16x128xf32>
    %73 = arith.divf %71, %72 : vector<16x128xf32>
    %74 = vector.extract_strided_slice %55 {offsets = [0, 256], sizes = [16, 128], strides = [1, 1]} : vector<16x384xf32> to vector<16x128xf32>
    %75 = vector.extract_strided_slice %57 {offsets = [0, 256], sizes = [16, 128], strides = [1, 1]} : vector<16x384xf32> to vector<16x128xf32>
    %76 = arith.addf %75, %15 : vector<16x128xf32>
    %77 = arith.mulf %65, %76 : vector<16x128xf32>
    %78 = arith.addf %74, %77 : vector<16x128xf32>
    %79 = math.tanh %78 : vector<16x128xf32>
    %cst_30 = arith.constant 1.000000e+00 : f32
    %80 = vector.broadcast %cst_30 : f32 to vector<16x128xf32>
    %81 = arith.subf %80, %73 : vector<16x128xf32>
    %82 = arith.mulf %81, %79 : vector<16x128xf32>
    %83 = arith.mulf %73, %48 : vector<16x128xf32>
    %84 = arith.addf %82, %83 : vector<16x128xf32>
    %85 = arith.index_cast %c1_i32 : i32 to index
    %c0_31 = arith.constant 0 : index
    %c0_32 = arith.constant 0 : index
    %86 = vector.load %arg6[%85, %c0_31, %c0_32] : memref<8x16x128xf32, #tpu.memory_space<vmem>>, vector<1x16x128xf32>
    %87 = vector.shape_cast %86 : vector<1x16x128xf32> to vector<16x128xf32>
    %88 = vector.shape_cast %84 : vector<16x128xf32> to vector<1x16x128xf32>
    tpu.vector_store %arg6[%85, %c0_31, %c0_32], %88 {strides = array<i32>} : memref<8x16x128xf32, #tpu.memory_space<vmem>>, vector<1x16x128xf32>,
    %c2_i32 = arith.constant 2 : i32
    %89 = arith.index_cast %c2_i32 : i32 to index
    %c0_33 = arith.constant 0 : index
    %c0_34 = arith.constant 0 : index
    %90 = vector.load %arg8[%89, %c0_33, %c0_34] : memref<8x16x384xf32, #tpu.memory_space<vmem>>, vector<1x16x384xf32>
    %91 = vector.shape_cast %90 : vector<1x16x384xf32> to vector<16x384xf32>
    %92 = arith.truncf %84 : vector<16x128xf32> to vector<16x128xbf16>
    %cst_35 = arith.constant dense<0.000000e+00> : vector<16x384xf32>
    %93 = tpu.matmul %92, %12, %cst_35 {dimension_numbers = #tpu.dot_dimension_numbers<[1], [0], [0], [1], [0, 0, 1, 1], [], []>} : vector<16x128xbf16>, vector<128x384xbf16>, vector<16x384xf32> -> vector<16x384xf32>
    %94 = vector.extract_strided_slice %91 {offsets = [0, 0], sizes = [16, 128], strides = [1, 1]} : vector<16x384xf32> to vector<16x128xf32>
    %95 = vector.extract_strided_slice %93 {offsets = [0, 0], sizes = [16, 128], strides = [1, 1]} : vector<16x384xf32> to vector<16x128xf32>
    %96 = arith.addf %94, %95 : vector<16x128xf32>
    %97 = arith.negf %96 : vector<16x128xf32>
    %98 = math.exp %97 : vector<16x128xf32>
    %cst_36 = arith.constant 1.000000e+00 : f32
    %99 = vector.broadcast %cst_36 : f32 to vector<16x128xf32>
    %100 = arith.addf %99, %98 : vector<16x128xf32>
    %101 = arith.divf %99, %100 : vector<16x128xf32>
    %102 = vector.extract_strided_slice %91 {offsets = [0, 128], sizes = [16, 128], strides = [1, 1]} : vector<16x384xf32> to vector<16x128xf32>
    %103 = vector.extract_strided_slice %93 {offsets = [0, 128], sizes = [16, 128], strides = [1, 1]} : vector<16x384xf32> to vector<16x128xf32>
    %104 = arith.addf %102, %103 : vector<16x128xf32>
    %105 = arith.negf %104 : vector<16x128xf32>
    %106 = math.exp %105 : vector<16x128xf32>
    %cst_37 = arith.constant 1.000000e+00 : f32
    %107 = vector.broadcast %cst_37 : f32 to vector<16x128xf32>
    %108 = arith.addf %107, %106 : vector<16x128xf32>
    %109 = arith.divf %107, %108 : vector<16x128xf32>
    %110 = vector.extract_strided_slice %91 {offsets = [0, 256], sizes = [16, 128], strides = [1, 1]} : vector<16x384xf32> to vector<16x128xf32>
    %111 = vector.extract_strided_slice %93 {offsets = [0, 256], sizes = [16, 128], strides = [1, 1]} : vector<16x384xf32> to vector<16x128xf32>
    %112 = arith.addf %111, %15 : vector<16x128xf32>
    %113 = arith.mulf %101, %112 : vector<16x128xf32>
    %114 = arith.addf %110, %113 : vector<16x128xf32>
    %115 = math.tanh %114 : vector<16x128xf32>
    %cst_38 = arith.constant 1.000000e+00 : f32
    %116 = vector.broadcast %cst_38 : f32 to vector<16x128xf32>
    %117 = arith.subf %116, %109 : vector<16x128xf32>
    %118 = arith.mulf %117, %115 : vector<16x128xf32>
    %119 = arith.mulf %109, %84 : vector<16x128xf32>
    %120 = arith.addf %118, %119 : vector<16x128xf32>
    %121 = arith.index_cast %c2_i32 : i32 to index
    %c0_39 = arith.constant 0 : index
    %c0_40 = arith.constant 0 : index
    %122 = vector.load %arg6[%121, %c0_39, %c0_40] : memref<8x16x128xf32, #tpu.memory_space<vmem>>, vector<1x16x128xf32>
    %123 = vector.shape_cast %122 : vector<1x16x128xf32> to vector<16x128xf32>
    %124 = vector.shape_cast %120 : vector<16x128xf32> to vector<1x16x128xf32>
    tpu.vector_store %arg6[%121, %c0_39, %c0_40], %124 {strides = array<i32>} : memref<8x16x128xf32, #tpu.memory_space<vmem>>, vector<1x16x128xf32>,
    %c3_i32 = arith.constant 3 : i32
    %125 = arith.index_cast %c3_i32 : i32 to index
    %c0_41 = arith.constant 0 : index
    %c0_42 = arith.constant 0 : index
    %126 = vector.load %arg8[%125, %c0_41, %c0_42] : memref<8x16x384xf32, #tpu.memory_space<vmem>>, vector<1x16x384xf32>
    %127 = vector.shape_cast %126 : vector<1x16x384xf32> to vector<16x384xf32>
    %128 = arith.truncf %120 : vector<16x128xf32> to vector<16x128xbf16>
    %cst_43 = arith.constant dense<0.000000e+00> : vector<16x384xf32>
    %129 = tpu.matmul %128, %12, %cst_43 {dimension_numbers = #tpu.dot_dimension_numbers<[1], [0], [0], [1], [0, 0, 1, 1], [], []>} : vector<16x128xbf16>, vector<128x384xbf16>, vector<16x384xf32> -> vector<16x384xf32>
    %130 = vector.extract_strided_slice %127 {offsets = [0, 0], sizes = [16, 128], strides = [1, 1]} : vector<16x384xf32> to vector<16x128xf32>
    %131 = vector.extract_strided_slice %129 {offsets = [0, 0], sizes = [16, 128], strides = [1, 1]} : vector<16x384xf32> to vector<16x128xf32>
    %132 = arith.addf %130, %131 : vector<16x128xf32>
    %133 = arith.negf %132 : vector<16x128xf32>
    %134 = math.exp %133 : vector<16x128xf32>
    %cst_44 = arith.constant 1.000000e+00 : f32
    %135 = vector.broadcast %cst_44 : f32 to vector<16x128xf32>
    %136 = arith.addf %135, %134 : vector<16x128xf32>
    %137 = arith.divf %135, %136 : vector<16x128xf32>
    %138 = vector.extract_strided_slice %127 {offsets = [0, 128], sizes = [16, 128], strides = [1, 1]} : vector<16x384xf32> to vector<16x128xf32>
    %139 = vector.extract_strided_slice %129 {offsets = [0, 128], sizes = [16, 128], strides = [1, 1]} : vector<16x384xf32> to vector<16x128xf32>
    %140 = arith.addf %138, %139 : vector<16x128xf32>
    %141 = arith.negf %140 : vector<16x128xf32>
    %142 = math.exp %141 : vector<16x128xf32>
    %cst_45 = arith.constant 1.000000e+00 : f32
    %143 = vector.broadcast %cst_45 : f32 to vector<16x128xf32>
    %144 = arith.addf %143, %142 : vector<16x128xf32>
    %145 = arith.divf %143, %144 : vector<16x128xf32>
    %146 = vector.extract_strided_slice %127 {offsets = [0, 256], sizes = [16, 128], strides = [1, 1]} : vector<16x384xf32> to vector<16x128xf32>
    %147 = vector.extract_strided_slice %129 {offsets = [0, 256], sizes = [16, 128], strides = [1, 1]} : vector<16x384xf32> to vector<16x128xf32>
    %148 = arith.addf %147, %15 : vector<16x128xf32>
    %149 = arith.mulf %137, %148 : vector<16x128xf32>
    %150 = arith.addf %146, %149 : vector<16x128xf32>
    %151 = math.tanh %150 : vector<16x128xf32>
    %cst_46 = arith.constant 1.000000e+00 : f32
    %152 = vector.broadcast %cst_46 : f32 to vector<16x128xf32>
    %153 = arith.subf %152, %145 : vector<16x128xf32>
    %154 = arith.mulf %153, %151 : vector<16x128xf32>
    %155 = arith.mulf %145, %120 : vector<16x128xf32>
    %156 = arith.addf %154, %155 : vector<16x128xf32>
    %157 = arith.index_cast %c3_i32 : i32 to index
    %c0_47 = arith.constant 0 : index
    %c0_48 = arith.constant 0 : index
    %158 = vector.load %arg6[%157, %c0_47, %c0_48] : memref<8x16x128xf32, #tpu.memory_space<vmem>>, vector<1x16x128xf32>
    %159 = vector.shape_cast %158 : vector<1x16x128xf32> to vector<16x128xf32>
    %160 = vector.shape_cast %156 : vector<16x128xf32> to vector<1x16x128xf32>
    tpu.vector_store %arg6[%157, %c0_47, %c0_48], %160 {strides = array<i32>} : memref<8x16x128xf32, #tpu.memory_space<vmem>>, vector<1x16x128xf32>,
    %c4_i32 = arith.constant 4 : i32
    %161 = arith.index_cast %c4_i32 : i32 to index
    %c0_49 = arith.constant 0 : index
    %c0_50 = arith.constant 0 : index
    %162 = vector.load %arg8[%161, %c0_49, %c0_50] : memref<8x16x384xf32, #tpu.memory_space<vmem>>, vector<1x16x384xf32>
    %163 = vector.shape_cast %162 : vector<1x16x384xf32> to vector<16x384xf32>
    %164 = arith.truncf %156 : vector<16x128xf32> to vector<16x128xbf16>
    %cst_51 = arith.constant dense<0.000000e+00> : vector<16x384xf32>
    %165 = tpu.matmul %164, %12, %cst_51 {dimension_numbers = #tpu.dot_dimension_numbers<[1], [0], [0], [1], [0, 0, 1, 1], [], []>} : vector<16x128xbf16>, vector<128x384xbf16>, vector<16x384xf32> -> vector<16x384xf32>
    %166 = vector.extract_strided_slice %163 {offsets = [0, 0], sizes = [16, 128], strides = [1, 1]} : vector<16x384xf32> to vector<16x128xf32>
    %167 = vector.extract_strided_slice %165 {offsets = [0, 0], sizes = [16, 128], strides = [1, 1]} : vector<16x384xf32> to vector<16x128xf32>
    %168 = arith.addf %166, %167 : vector<16x128xf32>
    %169 = arith.negf %168 : vector<16x128xf32>
    %170 = math.exp %169 : vector<16x128xf32>
    %cst_52 = arith.constant 1.000000e+00 : f32
    %171 = vector.broadcast %cst_52 : f32 to vector<16x128xf32>
    %172 = arith.addf %171, %170 : vector<16x128xf32>
    %173 = arith.divf %171, %172 : vector<16x128xf32>
    %174 = vector.extract_strided_slice %163 {offsets = [0, 128], sizes = [16, 128], strides = [1, 1]} : vector<16x384xf32> to vector<16x128xf32>
    %175 = vector.extract_strided_slice %165 {offsets = [0, 128], sizes = [16, 128], strides = [1, 1]} : vector<16x384xf32> to vector<16x128xf32>
    %176 = arith.addf %174, %175 : vector<16x128xf32>
    %177 = arith.negf %176 : vector<16x128xf32>
    %178 = math.exp %177 : vector<16x128xf32>
    %cst_53 = arith.constant 1.000000e+00 : f32
    %179 = vector.broadcast %cst_53 : f32 to vector<16x128xf32>
    %180 = arith.addf %179, %178 : vector<16x128xf32>
    %181 = arith.divf %179, %180 : vector<16x128xf32>
    %182 = vector.extract_strided_slice %163 {offsets = [0, 256], sizes = [16, 128], strides = [1, 1]} : vector<16x384xf32> to vector<16x128xf32>
    %183 = vector.extract_strided_slice %165 {offsets = [0, 256], sizes = [16, 128], strides = [1, 1]} : vector<16x384xf32> to vector<16x128xf32>
    %184 = arith.addf %183, %15 : vector<16x128xf32>
    %185 = arith.mulf %173, %184 : vector<16x128xf32>
    %186 = arith.addf %182, %185 : vector<16x128xf32>
    %187 = math.tanh %186 : vector<16x128xf32>
    %cst_54 = arith.constant 1.000000e+00 : f32
    %188 = vector.broadcast %cst_54 : f32 to vector<16x128xf32>
    %189 = arith.subf %188, %181 : vector<16x128xf32>
    %190 = arith.mulf %189, %187 : vector<16x128xf32>
    %191 = arith.mulf %181, %156 : vector<16x128xf32>
    %192 = arith.addf %190, %191 : vector<16x128xf32>
    %193 = arith.index_cast %c4_i32 : i32 to index
    %c0_55 = arith.constant 0 : index
    %c0_56 = arith.constant 0 : index
    %194 = vector.load %arg6[%193, %c0_55, %c0_56] : memref<8x16x128xf32, #tpu.memory_space<vmem>>, vector<1x16x128xf32>
    %195 = vector.shape_cast %194 : vector<1x16x128xf32> to vector<16x128xf32>
    %196 = vector.shape_cast %192 : vector<16x128xf32> to vector<1x16x128xf32>
    tpu.vector_store %arg6[%193, %c0_55, %c0_56], %196 {strides = array<i32>} : memref<8x16x128xf32, #tpu.memory_space<vmem>>, vector<1x16x128xf32>,
    %c5_i32 = arith.constant 5 : i32
    %197 = arith.index_cast %c5_i32 : i32 to index
    %c0_57 = arith.constant 0 : index
    %c0_58 = arith.constant 0 : index
    %198 = vector.load %arg8[%197, %c0_57, %c0_58] : memref<8x16x384xf32, #tpu.memory_space<vmem>>, vector<1x16x384xf32>
    %199 = vector.shape_cast %198 : vector<1x16x384xf32> to vector<16x384xf32>
    %200 = arith.truncf %192 : vector<16x128xf32> to vector<16x128xbf16>
    %cst_59 = arith.constant dense<0.000000e+00> : vector<16x384xf32>
    %201 = tpu.matmul %200, %12, %cst_59 {dimension_numbers = #tpu.dot_dimension_numbers<[1], [0], [0], [1], [0, 0, 1, 1], [], []>} : vector<16x128xbf16>, vector<128x384xbf16>, vector<16x384xf32> -> vector<16x384xf32>
    %202 = vector.extract_strided_slice %199 {offsets = [0, 0], sizes = [16, 128], strides = [1, 1]} : vector<16x384xf32> to vector<16x128xf32>
    %203 = vector.extract_strided_slice %201 {offsets = [0, 0], sizes = [16, 128], strides = [1, 1]} : vector<16x384xf32> to vector<16x128xf32>
    %204 = arith.addf %202, %203 : vector<16x128xf32>
    %205 = arith.negf %204 : vector<16x128xf32>
    %206 = math.exp %205 : vector<16x128xf32>
    %cst_60 = arith.constant 1.000000e+00 : f32
    %207 = vector.broadcast %cst_60 : f32 to vector<16x128xf32>
    %208 = arith.addf %207, %206 : vector<16x128xf32>
    %209 = arith.divf %207, %208 : vector<16x128xf32>
    %210 = vector.extract_strided_slice %199 {offsets = [0, 128], sizes = [16, 128], strides = [1, 1]} : vector<16x384xf32> to vector<16x128xf32>
    %211 = vector.extract_strided_slice %201 {offsets = [0, 128], sizes = [16, 128], strides = [1, 1]} : vector<16x384xf32> to vector<16x128xf32>
    %212 = arith.addf %210, %211 : vector<16x128xf32>
    %213 = arith.negf %212 : vector<16x128xf32>
    %214 = math.exp %213 : vector<16x128xf32>
    %cst_61 = arith.constant 1.000000e+00 : f32
    %215 = vector.broadcast %cst_61 : f32 to vector<16x128xf32>
    %216 = arith.addf %215, %214 : vector<16x128xf32>
    %217 = arith.divf %215, %216 : vector<16x128xf32>
    %218 = vector.extract_strided_slice %199 {offsets = [0, 256], sizes = [16, 128], strides = [1, 1]} : vector<16x384xf32> to vector<16x128xf32>
    %219 = vector.extract_strided_slice %201 {offsets = [0, 256], sizes = [16, 128], strides = [1, 1]} : vector<16x384xf32> to vector<16x128xf32>
    %220 = arith.addf %219, %15 : vector<16x128xf32>
    %221 = arith.mulf %209, %220 : vector<16x128xf32>
    %222 = arith.addf %218, %221 : vector<16x128xf32>
    %223 = math.tanh %222 : vector<16x128xf32>
    %cst_62 = arith.constant 1.000000e+00 : f32
    %224 = vector.broadcast %cst_62 : f32 to vector<16x128xf32>
    %225 = arith.subf %224, %217 : vector<16x128xf32>
    %226 = arith.mulf %225, %223 : vector<16x128xf32>
    %227 = arith.mulf %217, %192 : vector<16x128xf32>
    %228 = arith.addf %226, %227 : vector<16x128xf32>
    %229 = arith.index_cast %c5_i32 : i32 to index
    %c0_63 = arith.constant 0 : index
    %c0_64 = arith.constant 0 : index
    %230 = vector.load %arg6[%229, %c0_63, %c0_64] : memref<8x16x128xf32, #tpu.memory_space<vmem>>, vector<1x16x128xf32>
    %231 = vector.shape_cast %230 : vector<1x16x128xf32> to vector<16x128xf32>
    %232 = vector.shape_cast %228 : vector<16x128xf32> to vector<1x16x128xf32>
    tpu.vector_store %arg6[%229, %c0_63, %c0_64], %232 {strides = array<i32>} : memref<8x16x128xf32, #tpu.memory_space<vmem>>, vector<1x16x128xf32>,
    %c6_i32 = arith.constant 6 : i32
    %233 = arith.index_cast %c6_i32 : i32 to index
    %c0_65 = arith.constant 0 : index
    %c0_66 = arith.constant 0 : index
    %234 = vector.load %arg8[%233, %c0_65, %c0_66] : memref<8x16x384xf32, #tpu.memory_space<vmem>>, vector<1x16x384xf32>
    %235 = vector.shape_cast %234 : vector<1x16x384xf32> to vector<16x384xf32>
    %236 = arith.truncf %228 : vector<16x128xf32> to vector<16x128xbf16>
    %cst_67 = arith.constant dense<0.000000e+00> : vector<16x384xf32>
    %237 = tpu.matmul %236, %12, %cst_67 {dimension_numbers = #tpu.dot_dimension_numbers<[1], [0], [0], [1], [0, 0, 1, 1], [], []>} : vector<16x128xbf16>, vector<128x384xbf16>, vector<16x384xf32> -> vector<16x384xf32>
    %238 = vector.extract_strided_slice %235 {offsets = [0, 0], sizes = [16, 128], strides = [1, 1]} : vector<16x384xf32> to vector<16x128xf32>
    %239 = vector.extract_strided_slice %237 {offsets = [0, 0], sizes = [16, 128], strides = [1, 1]} : vector<16x384xf32> to vector<16x128xf32>
    %240 = arith.addf %238, %239 : vector<16x128xf32>
    %241 = arith.negf %240 : vector<16x128xf32>
    %242 = math.exp %241 : vector<16x128xf32>
    %cst_68 = arith.constant 1.000000e+00 : f32
    %243 = vector.broadcast %cst_68 : f32 to vector<16x128xf32>
    %244 = arith.addf %243, %242 : vector<16x128xf32>
    %245 = arith.divf %243, %244 : vector<16x128xf32>
    %246 = vector.extract_strided_slice %235 {offsets = [0, 128], sizes = [16, 128], strides = [1, 1]} : vector<16x384xf32> to vector<16x128xf32>
    %247 = vector.extract_strided_slice %237 {offsets = [0, 128], sizes = [16, 128], strides = [1, 1]} : vector<16x384xf32> to vector<16x128xf32>
    %248 = arith.addf %246, %247 : vector<16x128xf32>
    %249 = arith.negf %248 : vector<16x128xf32>
    %250 = math.exp %249 : vector<16x128xf32>
    %cst_69 = arith.constant 1.000000e+00 : f32
    %251 = vector.broadcast %cst_69 : f32 to vector<16x128xf32>
    %252 = arith.addf %251, %250 : vector<16x128xf32>
    %253 = arith.divf %251, %252 : vector<16x128xf32>
    %254 = vector.extract_strided_slice %235 {offsets = [0, 256], sizes = [16, 128], strides = [1, 1]} : vector<16x384xf32> to vector<16x128xf32>
    %255 = vector.extract_strided_slice %237 {offsets = [0, 256], sizes = [16, 128], strides = [1, 1]} : vector<16x384xf32> to vector<16x128xf32>
    %256 = arith.addf %255, %15 : vector<16x128xf32>
    %257 = arith.mulf %245, %256 : vector<16x128xf32>
    %258 = arith.addf %254, %257 : vector<16x128xf32>
    %259 = math.tanh %258 : vector<16x128xf32>
    %cst_70 = arith.constant 1.000000e+00 : f32
    %260 = vector.broadcast %cst_70 : f32 to vector<16x128xf32>
    %261 = arith.subf %260, %253 : vector<16x128xf32>
    %262 = arith.mulf %261, %259 : vector<16x128xf32>
    %263 = arith.mulf %253, %228 : vector<16x128xf32>
    %264 = arith.addf %262, %263 : vector<16x128xf32>
    %265 = arith.index_cast %c6_i32 : i32 to index
    %c0_71 = arith.constant 0 : index
    %c0_72 = arith.constant 0 : index
    %266 = vector.load %arg6[%265, %c0_71, %c0_72] : memref<8x16x128xf32, #tpu.memory_space<vmem>>, vector<1x16x128xf32>
    %267 = vector.shape_cast %266 : vector<1x16x128xf32> to vector<16x128xf32>
    %268 = vector.shape_cast %264 : vector<16x128xf32> to vector<1x16x128xf32>
    tpu.vector_store %arg6[%265, %c0_71, %c0_72], %268 {strides = array<i32>} : memref<8x16x128xf32, #tpu.memory_space<vmem>>, vector<1x16x128xf32>,
    %c7_i32 = arith.constant 7 : i32
    %269 = arith.index_cast %c7_i32 : i32 to index
    %c0_73 = arith.constant 0 : index
    %c0_74 = arith.constant 0 : index
    %270 = vector.load %arg8[%269, %c0_73, %c0_74] : memref<8x16x384xf32, #tpu.memory_space<vmem>>, vector<1x16x384xf32>
    %271 = vector.shape_cast %270 : vector<1x16x384xf32> to vector<16x384xf32>
    %272 = arith.truncf %264 : vector<16x128xf32> to vector<16x128xbf16>
    %cst_75 = arith.constant dense<0.000000e+00> : vector<16x384xf32>
    %273 = tpu.matmul %272, %12, %cst_75 {dimension_numbers = #tpu.dot_dimension_numbers<[1], [0], [0], [1], [0, 0, 1, 1], [], []>} : vector<16x128xbf16>, vector<128x384xbf16>, vector<16x384xf32> -> vector<16x384xf32>
    %274 = vector.extract_strided_slice %271 {offsets = [0, 0], sizes = [16, 128], strides = [1, 1]} : vector<16x384xf32> to vector<16x128xf32>
    %275 = vector.extract_strided_slice %273 {offsets = [0, 0], sizes = [16, 128], strides = [1, 1]} : vector<16x384xf32> to vector<16x128xf32>
    %276 = arith.addf %274, %275 : vector<16x128xf32>
    %277 = arith.negf %276 : vector<16x128xf32>
    %278 = math.exp %277 : vector<16x128xf32>
    %cst_76 = arith.constant 1.000000e+00 : f32
    %279 = vector.broadcast %cst_76 : f32 to vector<16x128xf32>
    %280 = arith.addf %279, %278 : vector<16x128xf32>
    %281 = arith.divf %279, %280 : vector<16x128xf32>
    %282 = vector.extract_strided_slice %271 {offsets = [0, 128], sizes = [16, 128], strides = [1, 1]} : vector<16x384xf32> to vector<16x128xf32>
    %283 = vector.extract_strided_slice %273 {offsets = [0, 128], sizes = [16, 128], strides = [1, 1]} : vector<16x384xf32> to vector<16x128xf32>
    %284 = arith.addf %282, %283 : vector<16x128xf32>
    %285 = arith.negf %284 : vector<16x128xf32>
    %286 = math.exp %285 : vector<16x128xf32>
    %cst_77 = arith.constant 1.000000e+00 : f32
    %287 = vector.broadcast %cst_77 : f32 to vector<16x128xf32>
    %288 = arith.addf %287, %286 : vector<16x128xf32>
    %289 = arith.divf %287, %288 : vector<16x128xf32>
    %290 = vector.extract_strided_slice %271 {offsets = [0, 256], sizes = [16, 128], strides = [1, 1]} : vector<16x384xf32> to vector<16x128xf32>
    %291 = vector.extract_strided_slice %273 {offsets = [0, 256], sizes = [16, 128], strides = [1, 1]} : vector<16x384xf32> to vector<16x128xf32>
    %292 = arith.addf %291, %15 : vector<16x128xf32>
    %293 = arith.mulf %281, %292 : vector<16x128xf32>
    %294 = arith.addf %290, %293 : vector<16x128xf32>
    %295 = math.tanh %294 : vector<16x128xf32>
    %cst_78 = arith.constant 1.000000e+00 : f32
    %296 = vector.broadcast %cst_78 : f32 to vector<16x128xf32>
    %297 = arith.subf %296, %289 : vector<16x128xf32>
    %298 = arith.mulf %297, %295 : vector<16x128xf32>
    %299 = arith.mulf %289, %264 : vector<16x128xf32>
    %300 = arith.addf %298, %299 : vector<16x128xf32>
    %301 = arith.index_cast %c7_i32 : i32 to index
    %c0_79 = arith.constant 0 : index
    %c0_80 = arith.constant 0 : index
    %302 = vector.load %arg6[%301, %c0_79, %c0_80] : memref<8x16x128xf32, #tpu.memory_space<vmem>>, vector<1x16x128xf32>
    %303 = vector.shape_cast %302 : vector<1x16x128xf32> to vector<16x128xf32>
    %304 = vector.shape_cast %300 : vector<16x128xf32> to vector<1x16x128xf32>
    tpu.vector_store %arg6[%301, %c0_79, %c0_80], %304 {strides = array<i32>} : memref<8x16x128xf32, #tpu.memory_space<vmem>>, vector<1x16x128xf32>,
    %c8_i32 = arith.constant 8 : i32
    %c0_81 = arith.constant 0 : index
    %c0_82 = arith.constant 0 : index
    %305 = vector.load %arg7[%c0_81, %c0_82] : memref<16x128xf32, #tpu.memory_space<vmem>>, vector<16x128xf32>
    tpu.vector_store %arg7[%c0_81, %c0_82], %300 {strides = array<i32>} : memref<16x128xf32, #tpu.memory_space<vmem>>, vector<16x128xf32>,
    return
  }
  func.func @transform_0(%arg0: i32) -> (i32, i32, i32) {
    %c0_i32 = arith.constant 0 : i32
    %c0_i32_0 = arith.constant 0 : i32
    %c0_i32_1 = arith.constant 0 : i32
    return %arg0, %c0_i32, %c0_i32_0 : i32, i32, i32
  }
  func.func @transform_1(%arg0: i32) -> (i32, i32) {
    %c0_i32 = arith.constant 0 : i32
    %c0_i32_0 = arith.constant 0 : i32
    %c0_i32_1 = arith.constant 0 : i32
    return %c0_i32, %c0_i32_0 : i32, i32
  }
  func.func @transform_2(%arg0: i32) -> (i32, i32) {
    %c0_i32 = arith.constant 0 : i32
    %c0_i32_0 = arith.constant 0 : i32
    %c0_i32_1 = arith.constant 0 : i32
    return %c0_i32, %c0_i32_0 : i32, i32
  }
  func.func @transform_3(%arg0: i32) -> (i32, i32) {
    %c0_i32 = arith.constant 0 : i32
    %c0_i32_0 = arith.constant 0 : i32
    %c0_i32_1 = arith.constant 0 : i32
    return %c0_i32, %c0_i32_0 : i32, i32
  }
  func.func @transform_4(%arg0: i32) -> (i32, i32) {
    %c0_i32 = arith.constant 0 : i32
    %c0_i32_0 = arith.constant 0 : i32
    %c0_i32_1 = arith.constant 0 : i32
    return %c0_i32, %c0_i32_0 : i32, i32
  }
  func.func @transform_5(%arg0: i32) -> (i32, i32, i32) {
    %c0_i32 = arith.constant 0 : i32
    %c0_i32_0 = arith.constant 0 : i32
    %c0_i32_1 = arith.constant 0 : i32
    return %arg0, %c0_i32, %c0_i32_0 : i32, i32, i32
  }
}

</mosaic_0001>

<bundles_post_ra>
// kernel: encoder_rnn_forward.1
= control target key start
LH: loop header
LB: loop body
LE: loop exit
PB: predicated region body
PF: predicated region fallthrough
CT: control target
= control target key end

     0   :  { %10 = vsyncpa [#allocation5], 0  ;;  %s3162_s0 = inlined_call_operand.vmem [shape: bf16[8,16,128], index: 0, kind: input, shape index: {}]   ;;  %s3163_s1 = inlined_call_operand.hbm [shape: bf16[128,384], index: 1, kind: input, shape index: {}]   ;;  %s3164_s2 = inlined_call_operand.hbm [shape: bf16[128,384], index: 2, kind: input, shape index: {}]   ;;  %s3165_s3 = inlined_call_operand.vmem [shape: f32[1,384], index: 3, kind: input, shape index: {}]   ;;  %s3166_s4 = inlined_call_operand.vmem [shape: f32[1,128], index: 4, kind: input, shape index: {}]   ;;  %s3167_s5 = inlined_call_operand.vmem [shape: f32[8,16,128], index: 5, kind: output, shape index: {}]  }
   0x1   :  { %s18_s20 = sshll.u32 %s3163_s1, 4  ;;  %s19_s20 = int_to_ptr.hbm [resolvable:$true] %s18_s20 }
   0x2   :  { %11 = vsyncpa [#allocation7], 0  ;;  %s2394_s21 = smov [#allocation4]   ;;  %s31_s25 = sshll.u32 %s3164_s2, 4  ;;  %s32_s25 = int_to_ptr.hbm [resolvable:$true] %s31_s25 }
   0x3   :  { %s20_s22 = sshll.u32 %s2394_s21, 4  ;;  %s2395_s26 = smov 192   ;;  %s21_s22 = int_to_ptr.vmem [resolvable:$true] %s20_s22 }
   0x4   :  { %s2396_s27 = smov 12   ;;  %s2397_s28 = smov [#allocation6]  }
   0x5   :  { %26 = dma.hbm_to_vmem [thread:$0]  %s19_s20, 3072, %s21_s22, [#allocation5], %s2395_s26, %s2395_s26, %s2396_s27  }
   0x6   :  { %s33_s29 = sshll.u32 %s2397_s28, 4  ;;  %s34_s29 = int_to_ptr.vmem [resolvable:$true] %s33_s29 }
   0x7   :  { %39 = dma.hbm_to_vmem [thread:$0]  %s32_s25, 3072, %s34_s29, [#allocation7], %s2395_s26, %s2395_s26, %s2396_s27  }
   0x8   :  { %2390 = dma.done.wait [#allocation5], 3072  }
   0x9   :  { %2391 = vsyncadd [#allocation5], 4294964224 }
   0xa   :  { %2392 = dma.done.wait [#allocation7], 3072  }
   0xb   :  { %2393 = vsyncadd [#allocation7], 4294964224  ;;  %v2063_v0 = vld [vmem:[#allocation6 + $0xa8] sm:$0xf]  ;;  %v2173_v1 = vld [vmem:[#allocation6 + $0xb0] sm:$0xf0] }
   0xc   :  { %v2051_v2 = vld [vmem:[#allocation6 + $0x90] sm:$0xf]  ;;  %v2435_v3 = vor.u32 %v2173_v1, %v2063_v0  ;;  %v2170_v4 = vld [vmem:[#allocation6 + $0x98] sm:$0xf0]  ;;  %v1967_v5 = vld [vmem:[#allocation4 + $0xa8] sm:$0xf] }
   0xd   :  { %v2149_v6 = vld [vmem:[#allocation4 + $0xb0] sm:$0xf0]  ;;  %v1955_v8 = vld [vmem:[#allocation4 + $0x90] sm:$0xf]  ;;  %v2438_v9 = vor.u32 %v2170_v4, %v2051_v2  ;;  %v2146_v10 = vld [vmem:[#allocation4 + $0x98] sm:$0xf0] }
   0xe   :  { %v1968_v7 = vor.u32 %v2149_v6, %v1967_v5  ;;  %658 = vmatpush.bf16.msra.mxu3 %v2435_v3  ;;  %v2039_v11 = vld [vmem:[#allocation6 + $0x78] sm:$0xf]  ;;  %v2167_v12 = vld [vmem:[#allocation6 + $0x80] sm:$0xf0]  ;;  %v1956_v13 = vor.u32 %v2146_v10, %v1955_v8  ;;  %v2027_v17 = vld [vmem:[#allocation6 + $0x60] sm:$0xf] }
   0xf   :  { %v1943_v14 = vld [vmem:[#allocation4 + $0x78] sm:$0xf]  ;;  %v2143_v15 = vld [vmem:[#allocation4 + $0x80] sm:$0xf0]  ;;  %v2441_v16 = vor.u32 %v2167_v12, %v2039_v11  ;;  %v2164_v18 = vld [vmem:[#allocation6 + $0x68] sm:$0xf0] }
  0x10   :  { %290 = vmatpush.bf16.msra.mxu0 %v1968_v7  ;;  %v1944_v19 = vor.u32 %v2143_v15, %v1943_v14  ;;  %v1931_v20 = vld [vmem:[#allocation4 + $0x60] sm:$0xf]  ;;  %v2140_v21 = vld [vmem:[#allocation4 + $0x68] sm:$0xf0]  ;;  %v2444_v23 = vor.u32 %v2164_v18, %v2027_v17  ;;  %v1969_v24 = vld [vmem:[#allocation4 + $0xb4] sm:$0xf0] }
  0x11   :  { %v2148_v22 = vld [vmem:[#allocation4 + $0xac] sm:$0xf]  ;;  %v2015_v25 = vld [vmem:[#allocation6 + $0x48] sm:$0xf]  ;;  %v2161_v26 = vld [vmem:[#allocation6 + $0x50] sm:$0xf0]  ;;  %v1932_v27 = vor.u32 %v2140_v21, %v1931_v20 }
  0x12   :  { %659 = vmatpush.bf16.msra.mxu3 %v2438_v9  ;;  %v1919_v28 = vld [vmem:[#allocation4 + $0x48] sm:$0xf]  ;;  %v1972_v29 = vor.u32 %v2148_v22, %v1969_v24  ;;  %v2137_v30 = vld [vmem:[#allocation4 + $0x50] sm:$0xf0]  ;;  %v1957_v32 = vld [vmem:[#allocation4 + $0x9c] sm:$0xf0]  ;;  %v2447_v34 = vor.u32 %v2161_v26, %v2015_v25 }
  0x13   :  { %v2145_v31 = vld [vmem:[#allocation4 + $0x94] sm:$0xf]  ;;  %v2142_v35 = vld [vmem:[#allocation4 + $0x7c] sm:$0xf]  ;;  %v1945_v36 = vld [vmem:[#allocation4 + $0x84] sm:$0xf0]  ;;  %v1920_v39 = vor.u32 %v2137_v30, %v1919_v28 }
  0x14   :  { %291 = vmatpush.bf16.msra.mxu0 %v1956_v13  ;;  %339 = vmatpush.bf16.msra.mxu1 %v1972_v29  ;;  %v1960_v33 = vor.u32 %v2145_v31, %v1957_v32  ;;  %v2003_v37 = vld [vmem:[#allocation6 + $0x30] sm:$0xf]  ;;  %v2158_v38 = vld [vmem:[#allocation6 + $0x38] sm:$0xf0]  ;;  %v1948_v42 = vor.u32 %v2142_v35, %v1945_v36  ;;  %v1991_v44 = vld [vmem:[#allocation6 + $0x18] sm:$0xf] }
  0x15   :  { %v1907_v40 = vld [vmem:[#allocation4 + $0x30] sm:$0xf]  ;;  %v2134_v41 = vld [vmem:[#allocation4 + $0x38] sm:$0xf0]  ;;  %v2450_v43 = vor.u32 %v2158_v38, %v2003_v37  ;;  %v2139_v45 = vld [vmem:[#allocation4 + $0x64] sm:$0xf] }
  0x16   :  { %660 = vmatpush.bf16.msra.mxu3 %v2441_v16  ;;  %v1933_v46 = vld [vmem:[#allocation4 + $0x6c] sm:$0xf0]  ;;  %v2155_v47 = vld [vmem:[#allocation6 + $0x20] sm:$0xf0]  ;;  %v1908_v48 = vor.u32 %v2134_v41, %v1907_v40  ;;  %v2150_v50 = vld [vmem:[#allocation4 + $0xb8] sm:$0xf0] }
  0x17   :  { %v1975_v49 = vld [vmem:[#allocation4 + $0xb0] sm:$0xf]  ;;  %v1895_v51 = vld [vmem:[#allocation4 + $0x18] sm:$0xf]  ;;  %v2131_v52 = vld [vmem:[#allocation4 + $0x20] sm:$0xf0]  ;;  %v1936_v55 = vor.u32 %v2139_v45, %v1933_v46  ;;  %v2453_v56 = vor.u32 %v2155_v47, %v1991_v44 }
  0x18   :  { %292 = vmatpush.bf16.msra.mxu0 %v1944_v19  ;;  %340 = vmatpush.bf16.msra.mxu1 %v1960_v33  ;;  %v1976_v53 = vor.u32 %v2150_v50, %v1975_v49  ;;  %v1979_v54 = vld [vmem:[#allocation6] sm:$0xf]  ;;  %v2152_v57 = vld [vmem:[#allocation6 + $0x8] sm:$0xf0]  ;;  %v1921_v59 = vld [vmem:[#allocation4 + $0x54] sm:$0xf0]  ;;  %v1896_v61 = vor.u32 %v2131_v52, %v1895_v51 }
  0x19   :  { %v2136_v58 = vld [vmem:[#allocation4 + $0x4c] sm:$0xf]  ;;  %v1963_v62 = vld [vmem:[#allocation4 + $0x98] sm:$0xf]  ;;  %v2147_v63 = vld [vmem:[#allocation4 + $0xa0] sm:$0xf0]  ;;  %v2456_v6 = vor.u32 %v2152_v57, %v1979_v54 }
  0x1a   :  { %661 = vmatpush.bf16.msra.mxu3 %v2444_v23  ;;  %388 = vmatpush.bf16.msra.mxu2 %v1976_v53  ;;  %v2172_v60 = vld [vmem:[#allocation6 + $0xac] sm:$0xf]  ;;  %v2065_v0 = vld [vmem:[#allocation6 + $0xb4] sm:$0xf0]  ;;  %v1883_v1 = vld [vmem:[#allocation4] sm:$0xf]  ;;  %v1964_v4 = vor.u32 %v2147_v63, %v1963_v62  ;;  %v1924_v5 = vor.u32 %v2136_v58, %v1921_v59 }
  0x1b   :  { %v2128_v2 = vld [vmem:[#allocation4 + $0x8] sm:$0xf0]  ;;  %v2133_v7 = vld [vmem:[#allocation4 + $0x34] sm:$0xf]  ;;  %v1909_v8 = vld [vmem:[#allocation4 + $0x3c] sm:$0xf0]  ;;  %v2458_v10 = vor.u32 %v2172_v60, %v2065_v0 }
  0x1c   :  { %293 = vmatpush.bf16.msra.mxu0 %v1932_v27  ;;  %341 = vmatpush.bf16.msra.mxu1 %v1948_v42  ;;  %v1884_v11 = vor.u32 %v2128_v2, %v1883_v1  ;;  %v1951_v12 = vld [vmem:[#allocation4 + $0x80] sm:$0xf]  ;;  %v2144_v13 = vld [vmem:[#allocation4 + $0x88] sm:$0xf0]  ;;  %v2169_v14 = vld [vmem:[#allocation6 + $0x94] sm:$0xf]  ;;  %v1912_v18 = vor.u32 %v2133_v7, %v1909_v8 }
  0x1d   :  { %v2053_v15 = vld [vmem:[#allocation6 + $0x9c] sm:$0xf0]  ;;  %v1952_v17 = vor.u32 %v2144_v13, %v1951_v12  ;;  %v2464_v19 = vld [vmem:[%s3162_s0] sm:$0xff]  ;;  %v1897_v21 = vld [vmem:[#allocation4 + $0x24] sm:$0xf0]  ;;  %v2398_v29 = vmov 0.0|0.0  }
  0x1e   :  { %662 = vmatpush.bf16.msra.mxu3 %v2447_v34  ;;  %389 = vmatpush.bf16.msra.mxu2 %v1964_v4  ;;  %v2130_v20 = vld [vmem:[#allocation4 + $0x1c] sm:$0xf]  ;;  %v2467_v22 = vor.u32 %v2169_v14, %v2053_v15  ;;  %v1939_v24 = vld [vmem:[#allocation4 + $0x68] sm:$0xf]  ;;  %v2141_v25 = vld [vmem:[#allocation4 + $0x70] sm:$0xf0] }
  0x1f   :  { %v2166_v26 = vld [vmem:[#allocation6 + $0x7c] sm:$0xf]  ;;  %v2041_v27 = vld [vmem:[#allocation6 + $0x84] sm:$0xf0]  ;;  %v1940_v28 = vor.u32 %v2141_v25, %v1939_v24  ;;  %v1900_v30 = vor.u32 %v2130_v20, %v1897_v21  ;;  %v2127_v31 = vld [vmem:[#allocation4 + $0x4] sm:$0xf] }
  0x20   :  { %294 = vmatpush.bf16.msra.mxu0 %v1920_v39  ;;  %342 = vmatpush.bf16.msra.mxu1 %v1936_v55  ;;  %v1885_v32 = vld [vmem:[#allocation4 + $0xc] sm:$0xf0]  ;;  %v2473_v33 = vor.u32 %v2166_v26, %v2041_v27  ;;  %v2138_v36 = vld [vmem:[#allocation4 + $0x58] sm:$0xf0]  ;;  %v2163_v37 = vld [vmem:[#allocation6 + $0x64] sm:$0xf] }
  0x21   :  { %v1927_v35 = vld [vmem:[#allocation4 + $0x50] sm:$0xf]  ;;  %v2174_v41 = vld [vmem:[#allocation6 + $0xb8] sm:$0xf0]  ;;  %v1888_v42 = vor.u32 %v2127_v31, %v1885_v32  ;;  %v1915_v45 = vld [vmem:[#allocation4 + $0x38] sm:$0xf] }
  0x22   :  { %663 = vmatpush.bf16.msra.mxu3 %v2450_v43  ;;  %390 = vmatpush.bf16.msra.mxu2 %v1952_v17  ;;  %v2029_v38 = vld [vmem:[#allocation6 + $0x6c] sm:$0xf0]  ;;  %v1928_v39 = vor.u32 %v2138_v36, %v1927_v35  ;;  %v2135_v46 = vld [vmem:[#allocation4 + $0x40] sm:$0xf0]  ;;  %v2160_v47 = vld [vmem:[#allocation6 + $0x4c] sm:$0xf] }
  0x23   :  { %v2071_v40 = vld [vmem:[#allocation6 + $0xb0] sm:$0xf]  ;;  %v2477_v44 = vor.u32 %v2163_v37, %v2029_v38  ;;  %v1916_v50 = vor.u32 %v2135_v46, %v1915_v45  ;;  %v2059_v51 = vld [vmem:[#allocation6 + $0x98] sm:$0xf]  ;;  %v2171_v52 = vld [vmem:[#allocation6 + $0xa0] sm:$0xf0] }
  0x24   :  { %295 = vmatpush.bf16.msra.mxu0 %v1908_v48  ;;  %343 = vmatpush.bf16.msra.mxu1 %v1924_v5  ;;  %v2017_v48 = vld [vmem:[#allocation6 + $0x54] sm:$0xf0]  ;;  %v2479_v49 = vor.u32 %v2174_v41, %v2071_v40  ;;  %v1903_v54 = vld [vmem:[#allocation4 + $0x20] sm:$0xf]  ;;  %v2132_v55 = vld [vmem:[#allocation4 + $0x28] sm:$0xf0]  ;;  %v2486_v59 = vor.u32 %v2171_v52, %v2059_v51 }
  0x25   :  { %v2484_v53 = vor.u32 %v2160_v47, %v2017_v48  ;;  %v2157_v57 = vld [vmem:[#allocation6 + $0x34] sm:$0xf]  ;;  %v2005_v58 = vld [vmem:[#allocation6 + $0x3c] sm:$0xf0]  ;;  %v1904_v60 = vor.u32 %v2132_v55, %v1903_v54  ;;  %v2168_v62 = vld [vmem:[#allocation6 + $0x88] sm:$0xf0] }
  0x26   :  { %664 = vmatpush.bf16.msra.mxu3 %v2453_v56  ;;  %391 = vmatpush.bf16.msra.mxu2 %v1940_v28  ;;  %v2492_v63 = vor.u32 %v2157_v57, %v2005_v58  ;;  %v1891_v0 = vld [vmem:[#allocation4 + $0x8] sm:$0xf]  ;;  %v2129_v1 = vld [vmem:[#allocation4 + $0x10] sm:$0xf0]  ;;  %v2154_v2 = vld [vmem:[#allocation6 + $0x1c] sm:$0xf] }
  0x27   :  { %v1993_v4 = vld [vmem:[#allocation6 + $0x24] sm:$0xf0]  ;;  %v1892_v7 = vor.u32 %v2129_v1, %v1891_v0  ;;  %v2151_v13 = vld [vmem:[#allocation6 + $0x4] sm:$0xf]  ;;  %v1981_v14 = vld [vmem:[#allocation6 + $0xc] sm:$0xf0] }
  0x28   :  { %296 = vmatpush.bf16.msra.mxu0 %v1896_v61  ;;  %344 = vmatpush.bf16.msra.mxu1 %v1912_v18  ;;  %v2047_v61 = vld [vmem:[#allocation6 + $0x80] sm:$0xf]  ;;  %v2035_v8 = vld [vmem:[#allocation6 + $0x68] sm:$0xf]  ;;  %v2499_v12 = vor.u32 %v2154_v2, %v1993_v4  ;;  %v2023_v17 = vld [vmem:[#allocation6 + $0x50] sm:$0xf]  ;;  %v2508_v20 = vor.u32 %v2151_v13, %v1981_v14 }
  0x29   :  { %v2494_v5 = vor.u32 %v2168_v62, %v2047_v61  ;;  %v2162_v18 = vld [vmem:[#allocation6 + $0x58] sm:$0xf0]  ;;  %v2011_v24 = vld [vmem:[#allocation6 + $0x38] sm:$0xf]  ;;  %v2159_v25 = vld [vmem:[#allocation6 + $0x40] sm:$0xf0] }
  0x2a   :  { %665 = vmatpush.bf16.msra.mxu3 %v2456_v6  ;;  %392 = vmatpush.bf16.msra.mxu2 %v1928_v39  ;;  %v2511_v21 = vor.u32 %v2162_v18, %v2023_v17  ;;  %v2521_v26 = vor.u32 %v2159_v25, %v2011_v24  ;;  %v1999_v27 = vld [vmem:[#allocation6 + $0x20] sm:$0xf]  ;;  %v2156_v28 = vld [vmem:[#allocation6 + $0x28] sm:$0xf0]  ;;  %v1987_v31 = vld [vmem:[#allocation6 + $0x8] sm:$0xf] }
  0x2b   :  { %v2153_v32 = vld [vmem:[#allocation6 + $0x10] sm:$0xf0]  ;;  %v2121_v36 = vld [vmem:[%s3162_s0 + $0x10] sm:$0xff]  ;;  %v2123_v37 = vld [vmem:[%s3162_s0 + $0x20] sm:$0xff] }
  0x2c   :  { %297 = vmatpush.bf16.msra.mxu0 %v1884_v11  ;;  %345 = vmatpush.bf16.msra.mxu1 %v1900_v30  ;;  %v2165_v11 = vld [vmem:[#allocation6 + $0x70] sm:$0xf0]  ;;  %v2529_v30 = vor.u32 %v2156_v28, %v1999_v27  ;;  %v2535_v35 = vor.u32 %v2153_v32, %v1987_v31  ;;  %v2597_v38 = vld [vmem:[%s3165_s3] sm:$0x7]  ;;  %v2124_v41 = vld [vmem:[%s3162_s0 + $0x28] sm:$0xff] }
  0x2d   :  { %666 = vmatmul.bf16.vlgmr.msra.gmra.mxu3 %v2398_v29  ;;  %v2502_v15 = vor.u32 %v2165_v11, %v2035_v8  ;;  %v2600_v39 = vperm.slane %v2597_v38, 0  ;;  %v2125_v54 = vld [vmem:[%s3162_s0 + $0x30] sm:$0xff]  ;;  %v2611_v57 = vperm.slane %v2597_v38, 1  ;;  %v2126_v13 = vld [vmem:[%s3162_s0 + $0x38] sm:$0xff] }
  0x2e   :  { %672 = vmatpush.bf16.msrb.mxu3 %v2458_v10  ;;  %393 = vmatpush.bf16.msra.mxu2 %v1916_v50 }
  0x2f   :  { %298 = vmatmul.bf16.vlgmr.msra.gmra.mxu0 %v2464_v19 }
  0x30   :  { %820 = vmatpush.bf16.msrb.mxu0 %v2458_v10  ;;  %346 = vmatpush.bf16.msra.mxu1 %v1888_v42 }
  0x32   :  { %673 = vmatpush.bf16.msrb.mxu3 %v2467_v22  ;;  %394 = vmatpush.bf16.msra.mxu2 %v1904_v60 }
  0x33   :  { %347 = vmatmul.bf16.vlgmr.msra.gmra.mxu1 %v2464_v19 }
  0x34   :  { %821 = vmatpush.bf16.msrb.mxu0 %v2467_v22  ;;  %834 = vmatpush.bf16.msrb.mxu1 %v2479_v49 }
  0x36   :  { %674 = vmatpush.bf16.msrb.mxu3 %v2473_v33  ;;  %395 = vmatpush.bf16.msra.mxu2 %v1892_v7 }
  0x38   :  { %822 = vmatpush.bf16.msrb.mxu0 %v2473_v33  ;;  %835 = vmatpush.bf16.msrb.mxu1 %v2486_v59 }
  0x39   :  { %396 = vmatmul.bf16.vlgmr.msra.gmra.mxu2 %v2464_v19  ;;  %v2120_v19 = vld [vmem:[%s3162_s0 + $0x8] sm:$0xff] }
  0x3a   :  { %675 = vmatpush.bf16.msrb.mxu3 %v2477_v44  ;;  %955 = vmatpush.bf16.msrb.mxu2 %v2435_v3 }
  0x3c   :  { %823 = vmatpush.bf16.msrb.mxu0 %v2477_v44  ;;  %836 = vmatpush.bf16.msrb.mxu1 %v2494_v5 }
  0x3e   :  { %676 = vmatpush.bf16.msrb.mxu3 %v2484_v53  ;;  %956 = vmatpush.bf16.msrb.mxu2 %v2438_v9 }
  0x3f   :  { %303 = vmatmul.bf16.gmra.mxu0 %v2120_v19 }
  0x40   :  { %824 = vmatpush.bf16.msrb.mxu0 %v2484_v53  ;;  %837 = vmatpush.bf16.msrb.mxu1 %v2502_v15 }
  0x42   :  { %677 = vmatpush.bf16.msrb.mxu3 %v2492_v63  ;;  %957 = vmatpush.bf16.msrb.mxu2 %v2441_v16 }
  0x43   :  { %352 = vmatmul.bf16.gmra.mxu1 %v2120_v19 }
  0x44   :  { %825 = vmatpush.bf16.msrb.mxu0 %v2492_v63  ;;  %838 = vmatpush.bf16.msrb.mxu1 %v2511_v21 }
  0x46   :  { %678 = vmatpush.bf16.msrb.mxu3 %v2499_v12  ;;  %958 = vmatpush.bf16.msrb.mxu2 %v2444_v23 }
  0x48   :  { %826 = vmatpush.bf16.msrb.mxu0 %v2499_v12  ;;  %839 = vmatpush.bf16.msrb.mxu1 %v2521_v26 }
  0x49   :  { %401 = vmatmul.bf16.gmra.mxu2 %v2120_v19 }
  0x4a   :  { %679 = vmatpush.bf16.msrb.mxu3 %v2508_v20  ;;  %959 = vmatpush.bf16.msrb.mxu2 %v2447_v34 }
  0x4c   :  { %827 = vmatpush.bf16.msrb.mxu0 %v2508_v20  ;;  %840 = vmatpush.bf16.msrb.mxu1 %v2529_v30 }
  0x4d   :  { %680 = vmatmul.bf16.vlgmr.msrb.gmra.mxu3 %v2398_v29 }
  0x4e   :  { %686 = vmatpush.bf16.msra.mxu3 %v2479_v49  ;;  %960 = vmatpush.bf16.msrb.mxu2 %v2450_v43 }
  0x4f   :  { %308 = vmatmul.bf16.gmra.mxu0 %v2121_v36 }
  0x50   :  { %983 = vmatpush.bf16.msra.mxu0 %v2479_v49  ;;  %841 = vmatpush.bf16.msrb.mxu1 %v2535_v35 }
  0x52   :  { %687 = vmatpush.bf16.msra.mxu3 %v2486_v59  ;;  %961 = vmatpush.bf16.msrb.mxu2 %v2453_v56 }
  0x53   :  { %357 = vmatmul.bf16.gmra.mxu1 %v2121_v36 }
  0x54   :  { %984 = vmatpush.bf16.msra.mxu0 %v2486_v59  ;;  %1104 = vmatpush.bf16.msra.mxu1 %v2435_v3 }
  0x56   :  { %688 = vmatpush.bf16.msra.mxu3 %v2494_v5  ;;  %962 = vmatpush.bf16.msrb.mxu2 %v2456_v6 }
  0x58   :  { %985 = vmatpush.bf16.msra.mxu0 %v2494_v5  ;;  %1105 = vmatpush.bf16.msra.mxu1 %v2438_v9 }
  0x59   :  { %406 = vmatmul.bf16.gmra.mxu2 %v2121_v36 }
  0x5a   :  { %689 = vmatpush.bf16.msra.mxu3 %v2502_v15  ;;  %1118 = vmatpush.bf16.msra.mxu2 %v2458_v10 }
  0x5c   :  { %986 = vmatpush.bf16.msra.mxu0 %v2502_v15  ;;  %1106 = vmatpush.bf16.msra.mxu1 %v2441_v16 }
  0x5e   :  { %690 = vmatpush.bf16.msra.mxu3 %v2511_v21  ;;  %1119 = vmatpush.bf16.msra.mxu2 %v2467_v22 }
  0x60   :  { %987 = vmatpush.bf16.msra.mxu0 %v2511_v21  ;;  %1107 = vmatpush.bf16.msra.mxu1 %v2444_v23 }
  0x62   :  { %691 = vmatpush.bf16.msra.mxu3 %v2521_v26  ;;  %1120 = vmatpush.bf16.msra.mxu2 %v2473_v33 }
  0x64   :  { %988 = vmatpush.bf16.msra.mxu0 %v2521_v26  ;;  %1108 = vmatpush.bf16.msra.mxu1 %v2447_v34 }
  0x66   :  { %692 = vmatpush.bf16.msra.mxu3 %v2529_v30  ;;  %1121 = vmatpush.bf16.msra.mxu2 %v2477_v44 }
  0x68   :  { %989 = vmatpush.bf16.msra.mxu0 %v2529_v30  ;;  %1109 = vmatpush.bf16.msra.mxu1 %v2450_v43 }
  0x6a   :  { %693 = vmatpush.bf16.msra.mxu3 %v2535_v35  ;;  %1122 = vmatpush.bf16.msra.mxu2 %v2484_v53 }
  0x6c   :  { %990 = vmatpush.bf16.msra.mxu0 %v2535_v35  ;;  %1110 = vmatpush.bf16.msra.mxu1 %v2453_v56 }
  0x6d   :  { %694 = vmatmul.bf16.vlgmr.msra.gmra.mxu3 %v2398_v29  ;;  %v2122_v29 = vld [vmem:[%s3162_s0 + $0x18] sm:$0xff] }
  0x6e   :  { %806 = vmatpush.bf16.msrb.mxu3 %v2435_v3  ;;  %1123 = vmatpush.bf16.msra.mxu2 %v2492_v63 }
  0x6f   :  { %313 = vmatmul.bf16.gmra.mxu0 %v2122_v29  ;;  %362 = vmatmul.bf16.gmra.mxu1 %v2122_v29 }
  0x70   :  { %1111 = vmatpush.bf16.msra.mxu1 %v2456_v6  ;;  %411 = vmatmul.bf16.gmra.mxu2 %v2122_v29 }
  0x72   :  { %807 = vmatpush.bf16.msrb.mxu3 %v2438_v9  ;;  %1124 = vmatpush.bf16.msra.mxu2 %v2499_v12 }
  0x76   :  { %808 = vmatpush.bf16.msrb.mxu3 %v2441_v16  ;;  %1125 = vmatpush.bf16.msra.mxu2 %v2508_v20 }
  0x7a   :  { %809 = vmatpush.bf16.msrb.mxu3 %v2444_v23 }
  0x7e   :  { %810 = vmatpush.bf16.msrb.mxu3 %v2447_v34 }
  0x7f   :  { %318 = vmatmul.bf16.gmra.mxu0 %v2123_v37  ;;  %367 = vmatmul.bf16.gmra.mxu1 %v2123_v37 }
  0x80   :  { %416 = vmatmul.bf16.gmra.mxu2 %v2123_v37 }
  0x82   :  { %811 = vmatpush.bf16.msrb.mxu3 %v2450_v43 }
  0x86   :  { %812 = vmatpush.bf16.msrb.mxu3 %v2453_v56 }
  0x8a   :  { %813 = vmatpush.bf16.msrb.mxu3 %v2456_v6 }
  0x8e   :  { %969 = vmatpush.bf16.msra.mxu3 %v2458_v10 }
  0x8f   :  { %323 = vmatmul.bf16.gmra.mxu0 %v2124_v41  ;;  %372 = vmatmul.bf16.gmra.mxu1 %v2124_v41 }
  0x90   :  { %421 = vmatmul.bf16.gmra.mxu2 %v2124_v41 }
  0x92   :  { %970 = vmatpush.bf16.msra.mxu3 %v2467_v22 }
  0x96   :  { %971 = vmatpush.bf16.msra.mxu3 %v2473_v33 }
  0x9a   :  { %972 = vmatpush.bf16.msra.mxu3 %v2477_v44 }
  0x9e   :  { %973 = vmatpush.bf16.msra.mxu3 %v2484_v53 }
  0x9f   :  { %328 = vmatmul.bf16.gmra.mxu0 %v2125_v54  ;;  %377 = vmatmul.bf16.gmra.mxu1 %v2125_v54 }
  0xa0   :  { %426 = vmatmul.bf16.gmra.mxu2 %v2125_v54 }
  0xa2   :  { %974 = vmatpush.bf16.msra.mxu3 %v2492_v63 }
  0xa6   :  { %975 = vmatpush.bf16.msra.mxu3 %v2499_v12 }
  0xaa   :  { %976 = vmatpush.bf16.msra.mxu3 %v2508_v20 }
  0xac   :  { %v299_v40 = vpop.f32.mrf.mxu0 }
  0xad   :  { %v300_v42 = vadd.f32 %v299_v40, %v2600_v39 }
  0xaf   :  { %333 = vmatmul.bf16.gmra.mxu0 %v2126_v13  ;;  %382 = vmatmul.bf16.gmra.mxu1 %v2126_v13 }
  0xb0   :  { %v667_v45 = vpop.f32.mrf.mxu3  ;;  %v348_v55 = vpop.f32.mrf.mxu1  ;;  %431 = vmatmul.bf16.gmra.mxu2 %v2126_v13 }
  0xb1   :  { %v700_v46 = vadd.f32 %v667_v45, %v300_v42  ;;  %v349_v61 = vadd.f32 %v348_v55, %v2611_v57 }
  0xb3   :  { %v2073_v48 = vmul.f32 -1.442695, %v700_v46 }
  0xb4   :  { %v301_v47 = vpop.f32.mrf.mxu0 }
  0xb5   :  { %v302_v50 = vadd.f32 %v301_v47, %v2600_v39  ;;  %2181 = vpow2.f32 %v2073_v48 }
  0xb8   :  { %v669_v51 = vpop.f32.mrf.mxu3  ;;  %v350_v2 = vpop.f32.mrf.mxu1 }
  0xb9   :  { %v701_v52 = vadd.f32 %v669_v51, %v302_v50  ;;  %v351_v8 = vadd.f32 %v350_v2, %v2611_v57  ;;  %v2630_v51 = vperm.slane %v2597_v38, 2 }
  0xbb   :  { %v2074_v58 = vmul.f32 -1.442695, %v701_v52  ;;  %v2182_v60 = vpop.eup %2181  ;;  %v2635_v52 = vld [vmem:[%s3166_s4] ss:$0 sm:$0xff] }
  0xbc   :  { %v708_v62 = vadd.f32 1.0, %v2182_v60 }
  0xbd   :  { %2183 = vpow2.f32 %v2074_v58  ;;  %v397_v58 = vpop.f32.mrf.mxu2 }
  0xbe   :  { %2185 = vrcp.f32 %v708_v62  ;;  %vm715_vm0 = vweird.f32 %v708_v62  ;;  %v721_v42 = vand.u32 2147483648, %v708_v62  ;;  %v719_v47 = vand.u32 2147483647, %v708_v62 }
  0xbf   :  { %v398_v2 = vadd.f32 %v397_v58, %v2630_v51 }
  0xc0   :  { %v722_v54 = vor.u32 1.1754944e-38, %v721_v42  ;;  %vm720_vm3 = vcmp.eq.f32.partialorder %v719_v47, 8.507059e+37 }
  0xc3   :  { %v2184_v7 = vpop.eup %2183 }
  0xc4   :  { %v2615_v11 = vadd.f32 1.0, %v2184_v7  ;;  %v2186_v14 = vpop.eup %2185 }
  0xc5   :  { %v711_v19 = vmul.f32 %v2186_v14, %v708_v62  ;;  %vm716_vm1 = vweird.f32 %v2186_v14 }
  0xc6   :  { %vm2625_vm2 = vmor %vm715_vm0, %vm716_vm1  ;;  %vm730_vm4 = vweird.f32 %v2615_v11  ;;  %v736_v38 = vand.u32 2147483648, %v2615_v11 }
  0xc7   :  { %v712_v28 = vsub.f32 1.0, %v711_v19 }
  0xc9   :  { %v713_v36 = vmul.f32 %v2186_v14, %v712_v28 }
  0xcb   :  { %v714_v46 = vadd.f32 %v2186_v14, %v713_v36 }
  0xcd   :  { %v718_v60 = vsel %vm2625_vm2, %v2186_v14, %v714_v46 }
  0xd0   :  { %v681_v0 = vpop.f32.mrf.mxu3 }
  0xd1   :  { %v740_v1 = vadd.f32 %v681_v0, %v349_v61 }
  0xd3   :  { %v2075_v4 = vmul.f32 -1.442695, %v740_v1 }
  0xd5   :  { %2187 = vpow2.f32 %v2075_v4  ;;  %v723_v4 = vsel %vm720_vm3, %v722_v54, %v718_v60 }
  0xd6   :  { %2189 = vrcp.f32 %v2615_v11 }
  0xd8   :  { %v683_v17 = vpop.f32.mrf.mxu3 }
  0xd9   :  { %v741_v18 = vadd.f32 %v683_v17, %v351_v8 }
  0xdb   :  { %v2188_v24 = vpop.eup %2187  ;;  %v2076_v25 = vmul.f32 -1.442695, %v741_v18 }
  0xdc   :  { %v748_v27 = vadd.f32 1.0, %v2188_v24  ;;  %v2190_v31 = vpop.eup %2189  ;;  %v734_v24 = vand.u32 2147483647, %v2615_v11 }
  0xdd   :  { %2191 = vpow2.f32 %v2076_v25  ;;  %v726_v40 = vmul.f32 %v2190_v31, %v2615_v11  ;;  %vm731_vm5 = vweird.f32 %v2190_v31 }
  0xde   :  { %2193 = vrcp.f32 %v748_v27  ;;  %vm755_vm6 = vweird.f32 %v748_v27  ;;  %v761_v14 = vand.u32 2147483648, %v748_v27  ;;  %v759_v25 = vand.u32 2147483647, %v748_v27  ;;  %vm2647_vm8 = vmor %vm730_vm4, %vm731_vm5 }
  0xdf   :  { %v727_v50 = vsub.f32 1.0, %v726_v40  ;;  %v737_v40 = vor.u32 1.1754944e-38, %v736_v38  ;;  %vm735_vm10 = vcmp.eq.f32.partialorder %v734_v24, 8.507059e+37 }
  0xe0   :  { %vm760_vm11 = vcmp.eq.f32.partialorder %v759_v25, 8.507059e+37  ;;  %v353_v25 = vpop.f32.mrf.mxu1 }
  0xe1   :  { %v728_v62 = vmul.f32 %v2190_v31, %v727_v50 }
  0xe3   :  { %v2192_v32 = vpop.eup %2191  ;;  %v729_v18 = vadd.f32 %v2190_v31, %v728_v62  ;;  %v2658_v62 = vpop.f32.mrf.mxu0 }
  0xe4   :  { %v2194_v29 = vpop.eup %2193  ;;  %v2621_v37 = vadd.f32 1.0, %v2192_v32 }
  0xe5   :  { %v751_v41 = vmul.f32 %v2194_v29, %v748_v27  ;;  %vm756_vm7 = vweird.f32 %v2194_v29  ;;  %v733_v42 = vsel %vm2647_vm8, %v2190_v31, %v729_v18 }
  0xe6   :  { %2195 = vrcp.f32 %v2621_v37  ;;  %vm757_vm9 = vmor %vm755_vm6, %vm756_vm7  ;;  %v738_v48 = vsel %vm735_vm10, %v737_v40, %v733_v42  ;;  %v776_v50 = vand.u32 2147483648, %v2621_v37  ;;  %vm770_vm13 = vweird.f32 %v2621_v37 }
  0xe7   :  { %v752_v45 = vsub.f32 1.0, %v751_v41  ;;  %v762_v41 = vor.u32 1.1754944e-38, %v761_v14 }
  0xe9   :  { %v753_v55 = vmul.f32 %v2194_v29, %v752_v45  ;;  %v399_v45 = vpop.f32.mrf.mxu2 }
  0xeb   :  { %v754_v8 = vadd.f32 %v2194_v29, %v753_v55  ;;  %v774_v55 = vand.u32 2147483647, %v2621_v37 }
  0xec   :  { %v2196_v61 = vpop.eup %2195 }
  0xed   :  { %v766_v0 = vmul.f32 %v2196_v61, %v2621_v37  ;;  %v758_v36 = vsel %vm757_vm9, %v2194_v29, %v754_v8  ;;  %vm771_vm12 = vweird.f32 %v2196_v61  ;;  %v400_v29 = vadd.f32 %v399_v45, %v2630_v51 }
  0xee   :  { %v763_v46 = vsel %vm760_vm11, %v762_v41, %v758_v36  ;;  %vm772_vm14 = vmor %vm770_vm13, %vm771_vm12  ;;  %vm775_vm15 = vcmp.eq.f32.partialorder %v774_v55, 8.507059e+37 }
  0xef   :  { %v767_v13 = vsub.f32 1.0, %v766_v0  ;;  %v788_v31 = vsub.f32 1.0, %v763_v46  ;;  %v792_v38 = vmul.f32 0.0, %v763_v46 }
  0xf0   :  { %v695_v1 = vpop.f32.mrf.mxu3 }
  0xf1   :  { %v780_v7 = vadd.f32 %v2635_v52, %v695_v1  ;;  %v768_v32 = vmul.f32 %v2196_v61, %v767_v13 }
  0xf3   :  { %v782_v17 = vmul.f32 %v780_v7, %v723_v4  ;;  %v769_v47 = vadd.f32 %v2196_v61, %v768_v32 }
  0xf5   :  { %v784_v28 = vadd.f32 %v782_v17, %v398_v2  ;;  %v773_v1 = vsel %vm772_vm14, %v2196_v61, %v769_v47  ;;  %v777_v2 = vor.u32 1.1754944e-38, %v776_v50  ;;  %v2666_v17 = vpop.f32.mrf.mxu0 }
  0xf7   :  { %2197 = vtanh.f32 %v784_v28  ;;  %v778_v7 = vsel %vm775_vm15, %v777_v2, %v773_v1  ;;  %v355_v28 = vpop.f32.mrf.mxu1  ;;  %v354_v1 = vadd.f32 %v353_v25, %v2611_v57 }
  0xf8   :  { %v697_v27 = vpop.f32.mrf.mxu3  ;;  %v789_v37 = vsub.f32 1.0, %v778_v7  ;;  %v793_v14 = vmul.f32 0.0, %v778_v7 }
  0xf9   :  { %v781_v11 = vadd.f32 %v2635_v52, %v697_v27 }
  0xfb   :  { %v783_v54 = vmul.f32 %v781_v11, %v738_v48 }
  0xfd   :  { %v2198_v58 = vpop.eup %2197  ;;  %v785_v60 = vadd.f32 %v783_v54, %v400_v29  ;;  %v2679_v24 = vpop.f32.mrf.mxu0 }
  0xfe   :  { %v790_v0 = vmul.f32 %v2198_v58, %v788_v31 }
  0xff   :  { %2199 = vtanh.f32 %v785_v60  ;;  %v2706_v36 = vpop.f32.mrf.mxu1 }
 0x100   :  { %v2660_v4 = vadd.f32 %v792_v38, %v790_v0 }
 0x102   :  { %796 = vst [vmem:[%s3167_s5] sm:$0xff] %v2660_v4 }
 0x105   :  { %v2200_v8 = vpop.eup %2199  ;;  %v2690_v19 = vpop.f32.mrf.mxu0 }
 0x106   :  { %v791_v13 = vmul.f32 %v2200_v8, %v789_v37  ;;  %v305_v8 = vadd.f32 %v2658_v62, %v2600_v39 }
 0x107   :  { %v2710_v41 = vpop.f32.mrf.mxu1 }
 0x108   :  { %v2668_v18 = vadd.f32 %v793_v14, %v791_v13  ;;  %v356_v14 = vadd.f32 %v355_v28, %v2611_v57 }
 0x10a   :  { %797 = vst [vmem:[%s3167_s5 + $0x8] sm:$0xff] %v2668_v18  ;;  %v805_v61 = vpack.c.bf16 %v2668_v18, %v2660_v4 }
 0x10c   :  { %814 = vmatmul.bf16.vlgmr.msrb.gmra.mxu3 %v805_v61  ;;  %828 = vmatmul.bf16.vlgmr.msrb.gmra.mxu0 %v805_v61 }
 0x10d   :  { %842 = vmatmul.bf16.vlgmr.msrb.gmra.mxu1 %v805_v61  ;;  %1132 = vmatpush.bf16.msrb.mxu3 %v2479_v49  ;;  %v2698_v32 = vpop.f32.mrf.mxu0 }
 0x10e   :  { %1253 = vmatpush.bf16.msrb.mxu0 %v2435_v3  ;;  %1267 = vmatpush.bf16.msrb.mxu1 %v2458_v10 }
 0x10f   :  { %v2714_v45 = vpop.f32.mrf.mxu1 }
 0x111   :  { %1133 = vmatpush.bf16.msrb.mxu3 %v2486_v59 }
 0x112   :  { %1254 = vmatpush.bf16.msrb.mxu0 %v2438_v9  ;;  %1268 = vmatpush.bf16.msrb.mxu1 %v2467_v22 }
 0x115   :  { %1134 = vmatpush.bf16.msrb.mxu3 %v2494_v5  ;;  %v2708_v40 = vpop.f32.mrf.mxu0 }
 0x116   :  { %1255 = vmatpush.bf16.msrb.mxu0 %v2441_v16  ;;  %1269 = vmatpush.bf16.msrb.mxu1 %v2473_v33 }
 0x117   :  { %v2718_v46 = vpop.f32.mrf.mxu1 }
 0x118   :  { %3174 = vst [vmem:[#allocation12_spill] sm:$0xff] %v2718_v46 }
 0x119   :  { %1135 = vmatpush.bf16.msrb.mxu3 %v2502_v15 }
 0x11a   :  { %1256 = vmatpush.bf16.msrb.mxu0 %v2444_v23  ;;  %1270 = vmatpush.bf16.msrb.mxu1 %v2477_v44 }
 0x11d   :  { %1136 = vmatpush.bf16.msrb.mxu3 %v2511_v21  ;;  %v2712_v42 = vpop.f32.mrf.mxu0 }
 0x11e   :  { %1257 = vmatpush.bf16.msrb.mxu0 %v2447_v34  ;;  %1271 = vmatpush.bf16.msrb.mxu1 %v2484_v53  ;;  %3172 = vst [vmem:[#allocation10_spill] sm:$0xff] %v2712_v42 }
 0x11f   :  { %v2722_v47 = vpop.f32.mrf.mxu1 }
 0x120   :  { %3176 = vst [vmem:[#allocation14_spill] sm:$0xff] %v2722_v47 }
 0x121   :  { %1137 = vmatpush.bf16.msrb.mxu3 %v2521_v26 }
 0x122   :  { %1258 = vmatpush.bf16.msrb.mxu0 %v2450_v43  ;;  %1272 = vmatpush.bf16.msrb.mxu1 %v2492_v63 }
 0x125   :  { %1138 = vmatpush.bf16.msrb.mxu3 %v2529_v30  ;;  %v2716_v27 = vpop.f32.mrf.mxu0 }
 0x126   :  { %1259 = vmatpush.bf16.msrb.mxu0 %v2453_v56  ;;  %1273 = vmatpush.bf16.msrb.mxu1 %v2499_v12  ;;  %3173 = vst [vmem:[#allocation11_spill] sm:$0xff] %v2716_v27 }
 0x127   :  { %v2726_v50 = vpop.f32.mrf.mxu1 }
 0x128   :  { %3178 = vst [vmem:[#allocation16_spill] sm:$0xff] %v2726_v50 }
 0x129   :  { %1139 = vmatpush.bf16.msrb.mxu3 %v2535_v35 }
 0x12a   :  { %1260 = vmatpush.bf16.msrb.mxu0 %v2456_v6  ;;  %1274 = vmatpush.bf16.msrb.mxu1 %v2508_v20 }
 0x12d   :  { %v2720_v11 = vpop.f32.mrf.mxu0 }
 0x12e   :  { %3175 = vst [vmem:[#allocation13_spill] sm:$0xff] %v2720_v11 }
 0x12f   :  { %v2730_v54 = vpop.f32.mrf.mxu1 }
 0x130   :  { %3180 = vst [vmem:[#allocation18_spill] sm:$0xff] %v2730_v54 }
 0x135   :  { %v2724_v48 = vpop.f32.mrf.mxu0 }
 0x136   :  { %3177 = vst [vmem:[#allocation15_spill] sm:$0xff] %v2724_v48  ;;  %v402_v48 = vpop.f32.mrf.mxu2 }
 0x137   :  { %v2734_v31 = vpop.f32.mrf.mxu1 }
 0x138   :  { %3182 = vst [vmem:[#allocation20_spill] sm:$0xff] %v2734_v31 }
 0x13d   :  { %v2728_v29 = vpop.f32.mrf.mxu0 }
 0x13e   :  { %3179 = vst [vmem:[#allocation17_spill] sm:$0xff] %v2728_v29 }
 0x13f   :  { %v2738_v60 = vpop.f32.mrf.mxu1 }
 0x140   :  { %3184 = vst [vmem:[#allocation22_spill] sm:$0xff] %v2738_v60 }
 0x145   :  { %v2732_v55 = vpop.f32.mrf.mxu0 }
 0x146   :  { %3181 = vst [vmem:[#allocation19_spill] sm:$0xff] %v2732_v55 }
 0x147   :  { %v2743_v38 = vpop.f32.mrf.mxu1 }
 0x148   :  { %3186 = vst [vmem:[#allocation24_spill] sm:$0xff] %v2743_v38 }
 0x14d   :  { %v2736_v58 = vpop.f32.mrf.mxu0 }
 0x14e   :  { %3183 = vst [vmem:[#allocation21_spill] sm:$0xff] %v2736_v58 }
 0x14f   :  { %v2748_v29 = vpop.f32.mrf.mxu1 }
 0x150   :  { %3187 = vst [vmem:[#allocation25_spill] sm:$0xff] %v2748_v29 }
 0x155   :  { %v2740_v0 = vpop.f32.mrf.mxu0 }
 0x156   :  { %3185 = vst [vmem:[#allocation23_spill] sm:$0xff] %v2740_v0 }
 0x189   :  { %v829_v2 = vpop.f32.mrf.mxu0 }
 0x18a   :  { %v888_v7 = vadd.f32 %v829_v2, %v354_v1  ;;  %v307_v1 = vadd.f32 %v2666_v17, %v2600_v39 }
 0x18c   :  { %v2079_v37 = vmul.f32 -1.442695, %v888_v7 }
 0x18e   :  { %2201 = vpow2.f32 %v2079_v37 }
 0x18f   :  { %v815_v13 = vpop.f32.mrf.mxu3 }
 0x190   :  { %v848_v61 = vadd.f32 %v815_v13, %v305_v8 }
 0x191   :  { %v831_v58 = vpop.f32.mrf.mxu0 }
 0x192   :  { %v2077_v55 = vmul.f32 -1.442695, %v848_v61  ;;  %v889_v60 = vadd.f32 %v831_v58, %v356_v14  ;;  %v2755_v58 = vpop.f32.mrf.mxu1 }
 0x193   :  { %3188 = vst [vmem:[#allocation26_spill] sm:$0xff] %v2755_v58 }
 0x194   :  { %v2202_v0 = vpop.eup %2201  ;;  %2203 = vpow2.f32 %v2077_v55  ;;  %v2080_v25 = vmul.f32 -1.442695, %v889_v60 }
 0x195   :  { %v2750_v38 = vadd.f32 1.0, %v2202_v0 }
 0x196   :  { %2205 = vpow2.f32 %v2080_v25 }
 0x197   :  { %v817_v62 = vpop.f32.mrf.mxu3  ;;  %2207 = vrcp.f32 %v2750_v38  ;;  %v909_v47 = vand.u32 2147483648, %v2750_v38  ;;  %vm903_vm5 = vweird.f32 %v2750_v38 }
 0x198   :  { %v849_v2 = vadd.f32 %v817_v62, %v307_v1 }
 0x19a   :  { %v2204_v28 = vpop.eup %2203  ;;  %v2078_v7 = vmul.f32 -1.442695, %v849_v2  ;;  %v843_v2 = vpop.f32.mrf.mxu1 }
 0x19b   :  { %v856_v37 = vadd.f32 1.0, %v2204_v28 }
 0x19c   :  { %v2206_v8 = vpop.eup %2205  ;;  %2209 = vpow2.f32 %v2078_v7 }
 0x19d   :  { %2211 = vrcp.f32 %v856_v37  ;;  %v2757_v55 = vadd.f32 1.0, %v2206_v8  ;;  %v2208_v60 = vpop.eup %2207  ;;  %v869_v28 = vand.u32 2147483648, %v856_v37  ;;  %v867_v8 = vand.u32 2147483647, %v856_v37 }
 0x19e   :  { %v899_v17 = vmul.f32 %v2208_v60, %v2750_v38  ;;  %vm863_vm1 = vweird.f32 %v856_v37  ;;  %vm904_vm4 = vweird.f32 %v2208_v60 }
 0x19f   :  { %2213 = vrcp.f32 %v2757_v55  ;;  %vm868_vm3 = vcmp.eq.f32.partialorder %v867_v8, 8.507059e+37  ;;  %vm2770_vm6 = vmor %vm903_vm5, %vm904_vm4  ;;  %vm918_vm13 = vweird.f32 %v2757_v55 }
 0x1a0   :  { %v900_v25 = vsub.f32 1.0, %v899_v17  ;;  %v870_v17 = vor.u32 1.1754944e-38, %v869_v28 }
 0x1a2   :  { %v2210_v0 = vpop.eup %2209  ;;  %v901_v58 = vmul.f32 %v2208_v60, %v900_v25 }
 0x1a3   :  { %v2212_v13 = vpop.eup %2211  ;;  %v857_v14 = vadd.f32 1.0, %v2210_v0  ;;  %v928_v0 = vadd.f32 %v2635_v52, %v843_v2 }
 0x1a4   :  { %v859_v61 = vmul.f32 %v2212_v13, %v856_v37  ;;  %vm864_vm0 = vweird.f32 %v2212_v13  ;;  %v902_v25 = vadd.f32 %v2208_v60, %v901_v58  ;;  %v907_v37 = vand.u32 2147483647, %v2750_v38  ;;  %v404_v38 = vpop.f32.mrf.mxu2 }
 0x1a5   :  { %2215 = vrcp.f32 %v857_v14  ;;  %v2761_v1 = vpop.eup %2213  ;;  %vm865_vm2 = vmor %vm863_vm1, %vm864_vm0  ;;  %v884_v2 = vand.u32 2147483648, %v857_v14  ;;  %vm878_vm8 = vweird.f32 %v857_v14 }
 0x1a6   :  { %v860_v62 = vsub.f32 1.0, %v859_v61  ;;  %v914_v29 = vmul.f32 %v2761_v1, %v2757_v55  ;;  %v403_v61 = vadd.f32 %v402_v48, %v2630_v51  ;;  %vm908_vm9 = vcmp.eq.f32.partialorder %v907_v37, 8.507059e+37 }
 0x1a7   :  { %vm919_vm12 = vweird.f32 %v2761_v1 }
 0x1a8   :  { %v861_v7 = vmul.f32 %v2212_v13, %v860_v62  ;;  %v915_v62 = vsub.f32 1.0, %v914_v29  ;;  %v845_v29 = vpop.f32.mrf.mxu1  ;;  %vm920_vm14 = vmor %vm918_vm13, %vm919_vm12 }
 0x1a9   :  { %v929_v8 = vadd.f32 %v2635_v52, %v845_v29 }
 0x1aa   :  { %v862_v31 = vadd.f32 %v2212_v13, %v861_v7  ;;  %v885_v7 = vor.u32 1.1754944e-38, %v884_v2 }
 0x1ab   :  { %v2216_v11 = vpop.eup %2215 }
 0x1ac   :  { %v874_v54 = vmul.f32 %v2216_v11, %v857_v14  ;;  %v866_v50 = vsel %vm865_vm2, %v2212_v13, %v862_v31  ;;  %vm879_vm7 = vweird.f32 %v2216_v11  ;;  %v882_v13 = vand.u32 2147483647, %v857_v14 }
 0x1ad   :  { %v871_v27 = vsel %vm868_vm3, %v870_v17, %v866_v50  ;;  %v916_v50 = vmul.f32 %v2761_v1, %v915_v62  ;;  %vm880_vm10 = vmor %vm878_vm8, %vm879_vm7  ;;  %v922_v62 = vand.u32 2147483647, %v2757_v55 }
 0x1ae   :  { %v930_v42 = vmul.f32 %v928_v0, %v871_v27  ;;  %v875_v46 = vsub.f32 1.0, %v874_v54  ;;  %v906_v27 = vsel %vm2770_vm6, %v2208_v60, %v902_v25  ;;  %v910_v54 = vor.u32 1.1754944e-38, %v909_v47 }
 0x1af   :  { %vm883_vm11 = vcmp.eq.f32.partialorder %v882_v13, 8.507059e+37  ;;  %v917_v17 = vadd.f32 %v2761_v1, %v916_v50  ;;  %v924_v60 = vand.u32 2147483648, %v2757_v55  ;;  %v405_v47 = vadd.f32 %v404_v38, %v2630_v51 }
 0x1b0   :  { %v932_v48 = vadd.f32 %v930_v42, %v403_v61  ;;  %v876_v31 = vmul.f32 %v2216_v11, %v875_v46  ;;  %v911_v42 = vsel %vm908_vm9, %v910_v54, %v906_v27  ;;  %vm923_vm15 = vcmp.eq.f32.partialorder %v922_v62, 8.507059e+37 }
 0x1b1   :  { %v936_v14 = vsub.f32 1.0, %v911_v42  ;;  %v921_v2 = vsel %vm920_vm14, %v2761_v1, %v917_v17  ;;  %v940_v28 = vmul.f32 %v911_v42, %v2660_v4 }
 0x1b2   :  { %2217 = vtanh.f32 %v932_v48  ;;  %v877_v58 = vadd.f32 %v2216_v11, %v876_v31  ;;  %v925_v48 = vor.u32 1.1754944e-38, %v924_v60 }
 0x1b4   :  { %v881_v46 = vsel %vm880_vm10, %v2216_v11, %v877_v58  ;;  %v926_v13 = vsel %vm923_vm15, %v925_v48, %v921_v2  ;;  %v312_v48 = vadd.f32 %v2690_v19, %v2600_v39 }
 0x1b5   :  { %v886_v0 = vsel %vm883_vm11, %v885_v7, %v881_v46  ;;  %v937_v55 = vsub.f32 1.0, %v926_v13  ;;  %v941_v27 = vmul.f32 %v926_v13, %v2668_v18  ;;  %v2810_v18 = vpop.f32.mrf.mxu2  ;;  %v361_v13 = vadd.f32 %v2710_v41, %v2611_v57 }
 0x1b6   :  { %v931_v61 = vmul.f32 %v929_v8, %v886_v0 }
 0x1b8   :  { %v2218_v25 = vpop.eup %2217  ;;  %v933_v37 = vadd.f32 %v931_v61, %v405_v47  ;;  %v310_v61 = vadd.f32 %v2679_v24, %v2600_v39 }
 0x1b9   :  { %v938_v11 = vmul.f32 %v2218_v25, %v936_v14  ;;  %v359_v14 = vadd.f32 %v2706_v36, %v2611_v57 }
 0x1ba   :  { %2219 = vtanh.f32 %v933_v37 }
 0x1bb   :  { %v2786_v31 = vadd.f32 %v940_v28, %v938_v11 }
 0x1bd   :  { %2081 = vst [vmem:[%s3167_s5 + $0x10] sm:$0xff] %v2786_v31  ;;  %v2821_v1 = vpop.f32.mrf.mxu2 }
 0x1c0   :  { %v2220_v50 = vpop.eup %2219 }
 0x1c1   :  { %v939_v29 = vmul.f32 %v2220_v50, %v937_v55 }
 0x1c3   :  { %v2793_v54 = vadd.f32 %v941_v27, %v939_v29 }
 0x1c5   :  { %2082 = vst [vmem:[%s3167_s5 + $0x18] sm:$0xff] %v2793_v54  ;;  %v954_v4 = vpack.c.bf16 %v2793_v54, %v2786_v31  ;;  %v2829_v58 = vpop.f32.mrf.mxu2 }
 0x1c7   :  { %963 = vmatmul.bf16.vlgmr.msrb.gmra.mxu2 %v954_v4  ;;  %977 = vmatmul.bf16.vlgmr.msra.gmra.mxu3 %v954_v4 }
 0x1c8   :  { %991 = vmatmul.bf16.vlgmr.msra.gmra.mxu0 %v954_v4  ;;  %1281 = vmatpush.bf16.msrb.mxu2 %v2479_v49 }
 0x1c9   :  { %1402 = vmatpush.bf16.msra.mxu3 %v2435_v3  ;;  %1416 = vmatpush.bf16.msra.mxu0 %v2458_v10 }
 0x1cc   :  { %1282 = vmatpush.bf16.msrb.mxu2 %v2486_v59 }
 0x1cd   :  { %1403 = vmatpush.bf16.msra.mxu3 %v2438_v9  ;;  %1417 = vmatpush.bf16.msra.mxu0 %v2467_v22  ;;  %v2831_v38 = vpop.f32.mrf.mxu2 }
 0x1d0   :  { %1283 = vmatpush.bf16.msrb.mxu2 %v2494_v5 }
 0x1d1   :  { %1404 = vmatpush.bf16.msra.mxu3 %v2441_v16  ;;  %1418 = vmatpush.bf16.msra.mxu0 %v2473_v33 }
 0x1d4   :  { %1284 = vmatpush.bf16.msrb.mxu2 %v2502_v15 }
 0x1d5   :  { %1405 = vmatpush.bf16.msra.mxu3 %v2444_v23  ;;  %1419 = vmatpush.bf16.msra.mxu0 %v2477_v44  ;;  %v2833_v7 = vpop.f32.mrf.mxu2 }
 0x1d8   :  { %1285 = vmatpush.bf16.msrb.mxu2 %v2511_v21 }
 0x1d9   :  { %1406 = vmatpush.bf16.msra.mxu3 %v2447_v34  ;;  %1420 = vmatpush.bf16.msra.mxu0 %v2484_v53 }
 0x1dc   :  { %1286 = vmatpush.bf16.msrb.mxu2 %v2521_v26 }
 0x1dd   :  { %1407 = vmatpush.bf16.msra.mxu3 %v2450_v43  ;;  %1421 = vmatpush.bf16.msra.mxu0 %v2492_v63  ;;  %v2835_v8 = vpop.f32.mrf.mxu2 }
 0x1de   :  { %3191 = vst [vmem:[#allocation27_spill] sm:$0xff] %v2835_v8 }
 0x1e0   :  { %1287 = vmatpush.bf16.msrb.mxu2 %v2529_v30 }
 0x1e1   :  { %1408 = vmatpush.bf16.msra.mxu3 %v2453_v56  ;;  %1422 = vmatpush.bf16.msra.mxu0 %v2499_v12 }
 0x1e4   :  { %1288 = vmatpush.bf16.msrb.mxu2 %v2535_v35 }
 0x1e5   :  { %1409 = vmatpush.bf16.msra.mxu3 %v2456_v6  ;;  %1423 = vmatpush.bf16.msra.mxu0 %v2508_v20  ;;  %v2837_v42 = vpop.f32.mrf.mxu2 }
 0x1e6   :  { %3192 = vst [vmem:[#allocation28_spill] sm:$0xff] %v2837_v42 }
 0x1ed   :  { %v2839_v46 = vpop.f32.mrf.mxu2 }
 0x1ee   :  { %3193 = vst [vmem:[#allocation29_spill] sm:$0xff] %v2839_v46 }
 0x1f5   :  { %v2841_v0 = vpop.f32.mrf.mxu2 }
 0x1f6   :  { %3194 = vst [vmem:[#allocation30_spill] sm:$0xff] %v2841_v0 }
 0x1fd   :  { %v2843_v17 = vpop.f32.mrf.mxu2 }
 0x1fe   :  { %3195 = vst [vmem:[#allocation31_spill] sm:$0xff] %v2843_v17 }
 0x205   :  { %v2845_v60 = vpop.f32.mrf.mxu2 }
 0x206   :  { %3196 = vst [vmem:[#allocation32_spill] sm:$0xff] %v2845_v60 }
 0x20d   :  { %v2847_v47 = vpop.f32.mrf.mxu2 }
 0x20e   :  { %3197 = vst [vmem:[#allocation33_spill] sm:$0xff] %v2847_v47 }
 0x24a   :  { %v964_v62 = vpop.f32.mrf.mxu2  ;;  %v978_v25 = vpop.f32.mrf.mxu3 }
 0x24b   :  { %v997_v37 = vadd.f32 %v964_v62, %v310_v61  ;;  %v1037_v11 = vadd.f32 %v978_v25, %v359_v14 }
 0x24d   :  { %v2083_v2 = vmul.f32 -1.442695, %v997_v37  ;;  %v2085_v28 = vmul.f32 -1.442695, %v1037_v11 }
 0x24f   :  { %2221 = vpow2.f32 %v2083_v2 }
 0x250   :  { %2223 = vpow2.f32 %v2085_v28 }
 0x252   :  { %v966_v55 = vpop.f32.mrf.mxu2  ;;  %v980_v50 = vpop.f32.mrf.mxu3 }
 0x253   :  { %v998_v24 = vadd.f32 %v966_v55, %v312_v48  ;;  %v1038_v29 = vadd.f32 %v980_v50, %v361_v13  ;;  %v992_v13 = vpop.f32.mrf.mxu0 }
 0x255   :  { %v2222_v27 = vpop.eup %2221  ;;  %v2084_v36 = vmul.f32 -1.442695, %v998_v24  ;;  %v2086_v61 = vmul.f32 -1.442695, %v1038_v29 }
 0x256   :  { %v2224_v4 = vpop.eup %2223  ;;  %v1005_v47 = vadd.f32 1.0, %v2222_v27 }
 0x257   :  { %v1045_v14 = vadd.f32 1.0, %v2224_v4  ;;  %2225 = vpow2.f32 %v2084_v36 }
 0x258   :  { %2227 = vrcp.f32 %v1005_v47  ;;  %v1018_v55 = vand.u32 2147483648, %v1005_v47  ;;  %v1016_v29 = vand.u32 2147483647, %v1005_v47  ;;  %vm1012_vm1 = vweird.f32 %v1005_v47 }
 0x259   :  { %2229 = vrcp.f32 %v1045_v14  ;;  %v1058_v46 = vand.u32 2147483648, %v1045_v14  ;;  %vm1052_vm5 = vweird.f32 %v1045_v14 }
 0x25a   :  { %2231 = vpow2.f32 %v2086_v61  ;;  %v1019_v61 = vor.u32 1.1754944e-38, %v1018_v55  ;;  %vm1017_vm3 = vcmp.eq.f32.partialorder %v1016_v29, 8.507059e+37 }
 0x25d   :  { %v2226_v62 = vpop.eup %2225 }
 0x25e   :  { %v2228_v25 = vpop.eup %2227  ;;  %v1006_v19 = vadd.f32 1.0, %v2226_v62  ;;  %v1077_v62 = vadd.f32 %v2635_v52, %v992_v13 }
 0x25f   :  { %v2230_v37 = vpop.eup %2229  ;;  %v1008_v11 = vmul.f32 %v2228_v25, %v1005_v47  ;;  %vm1013_vm0 = vweird.f32 %v2228_v25  ;;  %v1056_v47 = vand.u32 2147483647, %v1045_v14 }
 0x260   :  { %v2232_v41 = vpop.eup %2231  ;;  %v1048_v2 = vmul.f32 %v2230_v37, %v1045_v14  ;;  %2233 = vrcp.f32 %v1006_v19  ;;  %vm1014_vm2 = vmor %vm1012_vm1, %vm1013_vm0  ;;  %vm1053_vm4 = vweird.f32 %v2230_v37  ;;  %vm1027_vm8 = vweird.f32 %v1006_v19 }
 0x261   :  { %v1009_v28 = vsub.f32 1.0, %v1008_v11  ;;  %v2857_v48 = vadd.f32 1.0, %v2232_v41  ;;  %vm2864_vm6 = vmor %vm1052_vm5, %vm1053_vm4  ;;  %vm1057_vm9 = vcmp.eq.f32.partialorder %v1056_v47, 8.507059e+37 }
 0x262   :  { %v1049_v50 = vsub.f32 1.0, %v1048_v2 }
 0x263   :  { %v1010_v24 = vmul.f32 %v2228_v25, %v1009_v28  ;;  %2235 = vrcp.f32 %v2857_v48  ;;  %v408_v28 = vadd.f32 %v2810_v18, %v2630_v51  ;;  %vm1067_vm13 = vweird.f32 %v2857_v48 }
 0x264   :  { %v1050_v27 = vmul.f32 %v2230_v37, %v1049_v50 }
 0x265   :  { %v1011_v36 = vadd.f32 %v2228_v25, %v1010_v24  ;;  %v1033_v24 = vand.u32 2147483648, %v1006_v19 }
 0x266   :  { %v2234_v4 = vpop.eup %2233  ;;  %v1051_v17 = vadd.f32 %v2230_v37, %v1050_v27  ;;  %v994_v27 = vpop.f32.mrf.mxu0 }
 0x267   :  { %v1015_v60 = vsel %vm1014_vm2, %v2228_v25, %v1011_v36  ;;  %v1023_v11 = vmul.f32 %v2234_v4, %v1006_v19  ;;  %vm1028_vm7 = vweird.f32 %v2234_v4  ;;  %v1034_v14 = vor.u32 1.1754944e-38, %v1033_v24 }
 0x268   :  { %v1020_v41 = vsel %vm1017_vm3, %v1019_v61, %v1015_v60  ;;  %v1031_v60 = vand.u32 2147483647, %v1006_v19  ;;  %v1055_v18 = vsel %vm2864_vm6, %v2230_v37, %v1051_v17  ;;  %v1059_v61 = vor.u32 1.1754944e-38, %v1058_v46  ;;  %vm1029_vm10 = vmor %vm1027_vm8, %vm1028_vm7 }
 0x269   :  { %v2236_v2 = vpop.eup %2235  ;;  %v1079_v0 = vmul.f32 %v1077_v62, %v1020_v41  ;;  %v1024_v50 = vsub.f32 1.0, %v1023_v11  ;;  %v1078_v41 = vadd.f32 %v2635_v52, %v994_v27  ;;  %v1073_v46 = vand.u32 2147483648, %v2857_v48 }
 0x26a   :  { %v1063_v55 = vmul.f32 %v2236_v2, %v2857_v48  ;;  %vm1032_vm11 = vcmp.eq.f32.partialorder %v1031_v60, 8.507059e+37  ;;  %vm1068_vm12 = vweird.f32 %v2236_v2  ;;  %v1071_v19 = vand.u32 2147483647, %v2857_v48 }
 0x26b   :  { %v1025_v25 = vmul.f32 %v2234_v4, %v1024_v50  ;;  %v1081_v29 = vadd.f32 %v1079_v0, %v408_v28  ;;  %v1060_v50 = vsel %vm1057_vm9, %v1059_v61, %v1055_v18  ;;  %v410_v28 = vadd.f32 %v2821_v1, %v2630_v51  ;;  %vm1069_vm14 = vmor %vm1067_vm13, %vm1068_vm12 }
 0x26c   :  { %v1064_v36 = vsub.f32 1.0, %v1063_v55  ;;  %v1085_v37 = vsub.f32 1.0, %v1060_v50  ;;  %v1074_v13 = vor.u32 1.1754944e-38, %v1073_v46  ;;  %vm1072_vm15 = vcmp.eq.f32.partialorder %v1071_v19, 8.507059e+37 }
 0x26d   :  { %v1026_v62 = vadd.f32 %v2234_v4, %v1025_v25  ;;  %2237 = vtanh.f32 %v1081_v29  ;;  %v364_v61 = vadd.f32 %v2714_v45, %v2611_v57 }
 0x26e   :  { %v1065_v11 = vmul.f32 %v2236_v2, %v1064_v36 }
 0x26f   :  { %v1030_v42 = vsel %vm1029_vm10, %v2234_v4, %v1026_v62 }
 0x270   :  { %v1035_v8 = vsel %vm1032_vm11, %v1034_v14, %v1030_v42  ;;  %v1066_v0 = vadd.f32 %v2236_v2, %v1065_v11  ;;  %v1089_v42 = vmul.f32 %v1060_v50, %v2786_v31  ;;  %v317_v14 = vadd.f32 %v2708_v40, %v2600_v39 }
 0x271   :  { %v1080_v17 = vmul.f32 %v1078_v41, %v1035_v8 }
 0x272   :  { %v1070_v4 = vsel %vm1069_vm14, %v2236_v2, %v1066_v0 }
 0x273   :  { %v2238_v47 = vpop.eup %2237  ;;  %v1082_v24 = vadd.f32 %v1080_v17, %v410_v28  ;;  %v1075_v1 = vsel %vm1072_vm15, %v1074_v13, %v1070_v4 }
 0x274   :  { %v1087_v55 = vmul.f32 %v2238_v47, %v1085_v37  ;;  %v1086_v8 = vsub.f32 1.0, %v1075_v1  ;;  %v1090_v29 = vmul.f32 %v1075_v1, %v2793_v54  ;;  %v315_v54 = vadd.f32 %v2698_v32, %v2600_v39  ;;  %v3200_v32 = vld [vmem:[#allocation12_spill] sm:$0xff] }
 0x275   :  { %2239 = vtanh.f32 %v1082_v24  ;;  %v366_v19 = vadd.f32 %v3200_v32, %v2611_v57 }
 0x276   :  { %v2877_v25 = vadd.f32 %v1089_v42, %v1087_v55 }
 0x278   :  { %2087 = vst [vmem:[%s3167_s5 + $0x20] sm:$0xff] %v2877_v25 }
 0x27b   :  { %v2240_v48 = vpop.eup %2239 }
 0x27c   :  { %v1088_v60 = vmul.f32 %v2240_v48, %v1086_v8 }
 0x27e   :  { %v2884_v2 = vadd.f32 %v1090_v29, %v1088_v60 }
 0x280   :  { %2088 = vst [vmem:[%s3167_s5 + $0x28] sm:$0xff] %v2884_v2  ;;  %v1103_v31 = vpack.c.bf16 %v2884_v2, %v2877_v25 }
 0x282   :  { %1112 = vmatmul.bf16.vlgmr.msra.gmra.mxu1 %v1103_v31  ;;  %1126 = vmatmul.bf16.vlgmr.msra.gmra.mxu2 %v1103_v31 }
 0x283   :  { %1140 = vmatmul.bf16.vlgmr.msrb.gmra.mxu3 %v1103_v31  ;;  %1430 = vmatpush.bf16.msra.mxu1 %v2479_v49 }
 0x284   :  { %1551 = vmatpush.bf16.msra.mxu2 %v2435_v3  ;;  %1565 = vmatpush.bf16.msrb.mxu3 %v2458_v10 }
 0x287   :  { %1431 = vmatpush.bf16.msra.mxu1 %v2486_v59 }
 0x288   :  { %1552 = vmatpush.bf16.msra.mxu2 %v2438_v9  ;;  %1566 = vmatpush.bf16.msrb.mxu3 %v2467_v22 }
 0x28b   :  { %1432 = vmatpush.bf16.msra.mxu1 %v2494_v5 }
 0x28c   :  { %1553 = vmatpush.bf16.msra.mxu2 %v2441_v16  ;;  %1567 = vmatpush.bf16.msrb.mxu3 %v2473_v33 }
 0x28f   :  { %1433 = vmatpush.bf16.msra.mxu1 %v2502_v15 }
 0x290   :  { %1554 = vmatpush.bf16.msra.mxu2 %v2444_v23  ;;  %1568 = vmatpush.bf16.msrb.mxu3 %v2477_v44 }
 0x293   :  { %1434 = vmatpush.bf16.msra.mxu1 %v2511_v21 }
 0x294   :  { %1555 = vmatpush.bf16.msra.mxu2 %v2447_v34  ;;  %1569 = vmatpush.bf16.msrb.mxu3 %v2484_v53 }
 0x297   :  { %1435 = vmatpush.bf16.msra.mxu1 %v2521_v26 }
 0x298   :  { %1556 = vmatpush.bf16.msra.mxu2 %v2450_v43  ;;  %1570 = vmatpush.bf16.msrb.mxu3 %v2492_v63 }
 0x29b   :  { %1436 = vmatpush.bf16.msra.mxu1 %v2529_v30 }
 0x29c   :  { %1557 = vmatpush.bf16.msra.mxu2 %v2453_v56  ;;  %1571 = vmatpush.bf16.msrb.mxu3 %v2499_v12 }
 0x29f   :  { %1437 = vmatpush.bf16.msra.mxu1 %v2535_v35 }
 0x2a0   :  { %1558 = vmatpush.bf16.msra.mxu2 %v2456_v6  ;;  %1572 = vmatpush.bf16.msrb.mxu3 %v2508_v20 }
 0x2ff   :  { %v1113_v27 = vpop.f32.mrf.mxu1 }
 0x300   :  { %v1146_v36 = vadd.f32 %v1113_v27, %v315_v54 }
 0x302   :  { %v2089_v18 = vmul.f32 -1.442695, %v1146_v36 }
 0x304   :  { %2241 = vpow2.f32 %v2089_v18 }
 0x305   :  { %v1127_v62 = vpop.f32.mrf.mxu2 }
 0x306   :  { %v1186_v11 = vadd.f32 %v1127_v62, %v364_v61  ;;  %v1141_v60 = vpop.f32.mrf.mxu3 }
 0x307   :  { %v1115_v41 = vpop.f32.mrf.mxu1 }
 0x308   :  { %v2091_v50 = vmul.f32 -1.442695, %v1186_v11  ;;  %v1147_v0 = vadd.f32 %v1115_v41, %v317_v14  ;;  %v1226_v41 = vadd.f32 %v2635_v52, %v1141_v60 }
 0x30a   :  { %v2242_v28 = vpop.eup %2241  ;;  %2243 = vpow2.f32 %v2091_v50  ;;  %v2090_v17 = vmul.f32 -1.442695, %v1147_v0  ;;  %v413_v50 = vadd.f32 %v2829_v58, %v2630_v51 }
 0x30b   :  { %v1154_v46 = vadd.f32 1.0, %v2242_v28 }
 0x30c   :  { %2245 = vpow2.f32 %v2090_v17 }
 0x30d   :  { %2247 = vrcp.f32 %v1154_v46  ;;  %v1129_v37 = vpop.f32.mrf.mxu2  ;;  %v1167_v8 = vand.u32 2147483648, %v1154_v46  ;;  %v1165_v31 = vand.u32 2147483647, %v1154_v46  ;;  %vm1161_vm1 = vweird.f32 %v1154_v46 }
 0x30e   :  { %v1187_v45 = vadd.f32 %v1129_v37, %v366_v19 }
 0x30f   :  { %v1168_v61 = vor.u32 1.1754944e-38, %v1167_v8  ;;  %vm1166_vm3 = vcmp.eq.f32.partialorder %v1165_v31, 8.507059e+37 }
 0x310   :  { %v2244_v47 = vpop.eup %2243  ;;  %v2092_v24 = vmul.f32 -1.442695, %v1187_v45 }
 0x311   :  { %v1194_v4 = vadd.f32 1.0, %v2244_v47 }
 0x312   :  { %v2246_v55 = vpop.eup %2245  ;;  %2249 = vpow2.f32 %v2092_v24 }
 0x313   :  { %v2248_v40 = vpop.eup %2247  ;;  %2251 = vrcp.f32 %v1194_v4  ;;  %v1155_v13 = vadd.f32 1.0, %v2246_v55  ;;  %v1207_v32 = vand.u32 2147483648, %v1194_v4  ;;  %vm1201_vm5 = vweird.f32 %v1194_v4 }
 0x314   :  { %v1157_v42 = vmul.f32 %v2248_v40, %v1154_v46  ;;  %vm1162_vm0 = vweird.f32 %v2248_v40  ;;  %v1205_v46 = vand.u32 2147483647, %v1194_v4 }
 0x315   :  { %2253 = vrcp.f32 %v1155_v13  ;;  %vm1163_vm2 = vmor %vm1161_vm1, %vm1162_vm0  ;;  %v1182_v24 = vand.u32 2147483648, %v1155_v13  ;;  %vm1176_vm9 = vweird.f32 %v1155_v13 }
 0x316   :  { %v1158_v1 = vsub.f32 1.0, %v1157_v42  ;;  %v1180_v42 = vand.u32 2147483647, %v1155_v13  ;;  %vm1206_vm8 = vcmp.eq.f32.partialorder %v1205_v46, 8.507059e+37 }
 0x318   :  { %v2250_v48 = vpop.eup %2249  ;;  %v1159_v29 = vmul.f32 %v2248_v40, %v1158_v1  ;;  %v1208_v1 = vor.u32 1.1754944e-38, %v1207_v32  ;;  %vm1181_vm11 = vcmp.eq.f32.partialorder %v1180_v42, 8.507059e+37 }
 0x319   :  { %v2252_v54 = vpop.eup %2251  ;;  %v2924_v27 = vadd.f32 1.0, %v2250_v48  ;;  %v1143_v48 = vpop.f32.mrf.mxu3 }
 0x31a   :  { %v1197_v36 = vmul.f32 %v2252_v54, %v1194_v4  ;;  %v1160_v18 = vadd.f32 %v2248_v40, %v1159_v29  ;;  %vm1202_vm4 = vweird.f32 %v2252_v54  ;;  %v1183_v4 = vor.u32 1.1754944e-38, %v1182_v24 }
 0x31b   :  { %2255 = vrcp.f32 %v2924_v27  ;;  %v2254_v62 = vpop.eup %2253  ;;  %vm1203_vm6 = vmor %vm1201_vm5, %vm1202_vm4  ;;  %vm1216_vm13 = vweird.f32 %v2924_v27 }
 0x31c   :  { %v1198_v14 = vsub.f32 1.0, %v1197_v36  ;;  %v1164_v11 = vsel %vm1163_vm2, %v2248_v40, %v1160_v18  ;;  %v1172_v28 = vmul.f32 %v2254_v62, %v1155_v13  ;;  %vm1177_vm7 = vweird.f32 %v2254_v62 }
 0x31d   :  { %v1169_v0 = vsel %vm1166_vm3, %v1168_v61, %v1164_v11  ;;  %vm1178_vm10 = vmor %vm1176_vm9, %vm1177_vm7  ;;  %v1227_v18 = vadd.f32 %v2635_v52, %v1143_v48 }
 0x31e   :  { %v1199_v17 = vmul.f32 %v2252_v54, %v1198_v14  ;;  %v1228_v19 = vmul.f32 %v1226_v41, %v1169_v0  ;;  %v1173_v37 = vsub.f32 1.0, %v1172_v28  ;;  %v1222_v41 = vand.u32 2147483648, %v2924_v27 }
 0x31f   :  { %v1220_v28 = vand.u32 2147483647, %v2924_v27 }
 0x320   :  { %v1200_v45 = vadd.f32 %v2252_v54, %v1199_v17  ;;  %v1230_v47 = vadd.f32 %v1228_v19, %v413_v50  ;;  %v1174_v40 = vmul.f32 %v2254_v62, %v1173_v37  ;;  %v1223_v19 = vor.u32 1.1754944e-38, %v1222_v41 }
 0x321   :  { %v2256_v55 = vpop.eup %2255  ;;  %vm1221_vm15 = vcmp.eq.f32.partialorder %v1220_v28, 8.507059e+37 }
 0x322   :  { %v1204_v8 = vsel %vm1203_vm6, %v2252_v54, %v1200_v45  ;;  %2257 = vtanh.f32 %v1230_v47  ;;  %v1212_v58 = vmul.f32 %v2256_v55, %v2924_v27  ;;  %v1175_v60 = vadd.f32 %v2254_v62, %v1174_v40 }
 0x323   :  { %v1209_v29 = vsel %vm1206_vm8, %v1208_v1, %v1204_v8  ;;  %vm1217_vm12 = vweird.f32 %v2256_v55  ;;  %v415_v54 = vadd.f32 %v2831_v38, %v2630_v51 }
 0x324   :  { %v1213_v31 = vsub.f32 1.0, %v1212_v58  ;;  %v1179_v36 = vsel %vm1178_vm10, %v2254_v62, %v1175_v60  ;;  %v1234_v11 = vsub.f32 1.0, %v1209_v29  ;;  %vm1218_vm14 = vmor %vm1216_vm13, %vm1217_vm12  ;;  %v1238_v52 = vmul.f32 %v1209_v29, %v2877_v25 }
 0x325   :  { %v1184_v14 = vsel %vm1181_vm11, %v1183_v4, %v1179_v36 }
 0x326   :  { %v1214_v61 = vmul.f32 %v2256_v55, %v1213_v31  ;;  %v1229_v50 = vmul.f32 %v1227_v18, %v1184_v14 }
 0x328   :  { %v2258_v0 = vpop.eup %2257  ;;  %v1215_v13 = vadd.f32 %v2256_v55, %v1214_v61  ;;  %v1231_v17 = vadd.f32 %v1229_v50, %v415_v54 }
 0x329   :  { %v1236_v62 = vmul.f32 %v2258_v0, %v1234_v11 }
 0x32a   :  { %v1219_v32 = vsel %vm1218_vm14, %v2256_v55, %v1215_v13  ;;  %2259 = vtanh.f32 %v1231_v17 }
 0x32b   :  { %v2938_v46 = vadd.f32 %v1238_v52, %v1236_v62  ;;  %v1224_v38 = vsel %vm1221_vm15, %v1223_v19, %v1219_v32  ;;  %v2991_v19 = vld [vmem:[%s3166_s4] ss:$0 sm:$0xff] }
 0x32c   :  { %v1235_v37 = vsub.f32 1.0, %v1224_v38  ;;  %v1239_v47 = vmul.f32 %v1224_v38, %v2884_v2 }
 0x32d   :  { %2093 = vst [vmem:[%s3167_s5 + $0x30] sm:$0xff] %v2938_v46 }
 0x330   :  { %v2260_v45 = vpop.eup %2259 }
 0x331   :  { %v1237_v27 = vmul.f32 %v2260_v45, %v1235_v37 }
 0x333   :  { %v2945_v24 = vadd.f32 %v1239_v47, %v1237_v27 }
 0x335   :  { %2094 = vst [vmem:[%s3167_s5 + $0x38] sm:$0xff] %v2945_v24  ;;  %v1252_v25 = vpack.c.bf16 %v2945_v24, %v2938_v46 }
 0x337   :  { %1261 = vmatmul.bf16.vlgmr.msrb.gmra.mxu0 %v1252_v25  ;;  %1275 = vmatmul.bf16.vlgmr.msrb.gmra.mxu1 %v1252_v25 }
 0x338   :  { %1289 = vmatmul.bf16.vlgmr.msrb.gmra.mxu2 %v1252_v25  ;;  %1579 = vmatpush.bf16.msrb.mxu0 %v2479_v49  ;;  %v418_v25 = vadd.f32 %v2833_v7, %v2630_v51 }
 0x339   :  { %1700 = vmatpush.bf16.msrb.mxu1 %v2435_v3  ;;  %1714 = vmatpush.bf16.msrb.mxu2 %v2458_v10  ;;  %v3201_v3 = vld [vmem:[#allocation10_spill] sm:$0xff] }
 0x33c   :  { %1580 = vmatpush.bf16.msrb.mxu0 %v2486_v59 }
 0x33d   :  { %1701 = vmatpush.bf16.msrb.mxu1 %v2438_v9  ;;  %1715 = vmatpush.bf16.msrb.mxu2 %v2467_v22  ;;  %v320_v9 = vadd.f32 %v3201_v3, %v2600_v39 }
 0x340   :  { %1581 = vmatpush.bf16.msrb.mxu0 %v2494_v5 }
 0x341   :  { %1702 = vmatpush.bf16.msrb.mxu1 %v2441_v16  ;;  %1716 = vmatpush.bf16.msrb.mxu2 %v2473_v33  ;;  %v3202_v16 = vld [vmem:[#allocation14_spill] sm:$0xff] }
 0x344   :  { %1582 = vmatpush.bf16.msrb.mxu0 %v2502_v15 }
 0x345   :  { %1703 = vmatpush.bf16.msrb.mxu1 %v2444_v23  ;;  %1717 = vmatpush.bf16.msrb.mxu2 %v2477_v44  ;;  %v369_v23 = vadd.f32 %v3202_v16, %v2611_v57  ;;  %v3203_v44 = vld [vmem:[#allocation11_spill] sm:$0xff] }
 0x348   :  { %1583 = vmatpush.bf16.msrb.mxu0 %v2511_v21 }
 0x349   :  { %1704 = vmatpush.bf16.msrb.mxu1 %v2447_v34  ;;  %1718 = vmatpush.bf16.msrb.mxu2 %v2484_v53  ;;  %v322_v53 = vadd.f32 %v3203_v44, %v2600_v39 }
 0x34c   :  { %1584 = vmatpush.bf16.msrb.mxu0 %v2521_v26 }
 0x34d   :  { %1705 = vmatpush.bf16.msrb.mxu1 %v2450_v43  ;;  %1719 = vmatpush.bf16.msrb.mxu2 %v2492_v63 }
 0x350   :  { %1585 = vmatpush.bf16.msrb.mxu0 %v2529_v30 }
 0x351   :  { %1706 = vmatpush.bf16.msrb.mxu1 %v2453_v56  ;;  %1720 = vmatpush.bf16.msrb.mxu2 %v2499_v12 }
 0x354   :  { %1586 = vmatpush.bf16.msrb.mxu0 %v2535_v35 }
 0x355   :  { %1707 = vmatpush.bf16.msrb.mxu1 %v2456_v6  ;;  %1721 = vmatpush.bf16.msrb.mxu2 %v2508_v20  ;;  %v3204_v6 = vld [vmem:[#allocation16_spill] sm:$0xff] }
 0x356   :  { %v371_v63 = vadd.f32 %v3204_v6, %v2611_v57 }
 0x3b4   :  { %v1262_v34 = vpop.f32.mrf.mxu0  ;;  %v1276_v43 = vpop.f32.mrf.mxu1 }
 0x3b5   :  { %v1295_v10 = vadd.f32 %v1262_v34, %v320_v9  ;;  %v1335_v22 = vadd.f32 %v1276_v43, %v369_v23 }
 0x3b7   :  { %v2095_v33 = vmul.f32 -1.442695, %v1295_v10  ;;  %v2097_v56 = vmul.f32 -1.442695, %v1335_v22 }
 0x3b9   :  { %2261 = vpow2.f32 %v2095_v33 }
 0x3ba   :  { %2263 = vpow2.f32 %v2097_v56 }
 0x3bb   :  { %v1290_v41 = vpop.f32.mrf.mxu2 }
 0x3bc   :  { %v1264_v12 = vpop.f32.mrf.mxu0  ;;  %v1278_v20 = vpop.f32.mrf.mxu1  ;;  %v1375_v38 = vadd.f32 %v2991_v19, %v1290_v41 }
 0x3bd   :  { %v1296_v2 = vadd.f32 %v1264_v12, %v322_v53  ;;  %v1336_v55 = vadd.f32 %v1278_v20, %v371_v63 }
 0x3bf   :  { %v2262_v40 = vpop.eup %2261  ;;  %v2096_v42 = vmul.f32 -1.442695, %v1296_v2  ;;  %v2098_v58 = vmul.f32 -1.442695, %v1336_v55 }
 0x3c0   :  { %v2264_v1 = vpop.eup %2263  ;;  %v1303_v8 = vadd.f32 1.0, %v2262_v40 }
 0x3c1   :  { %v1343_v48 = vadd.f32 1.0, %v2264_v1  ;;  %2265 = vpow2.f32 %v2096_v42 }
 0x3c2   :  { %2267 = vrcp.f32 %v1303_v8  ;;  %v1316_v50 = vand.u32 2147483648, %v1303_v8  ;;  %v1314_v13 = vand.u32 2147483647, %v1303_v8  ;;  %vm1310_vm1 = vweird.f32 %v1303_v8 }
 0x3c3   :  { %2269 = vrcp.f32 %v1343_v48  ;;  %v1356_v3 = vand.u32 2147483648, %v1343_v48  ;;  %vm1350_vm5 = vweird.f32 %v1343_v48  ;;  %v1354_v23 = vand.u32 2147483647, %v1343_v48  ;;  %v1292_v53 = vpop.f32.mrf.mxu2 }
 0x3c4   :  { %2271 = vpow2.f32 %v2098_v58  ;;  %v1317_v52 = vor.u32 1.1754944e-38, %v1316_v50  ;;  %vm1315_vm3 = vcmp.eq.f32.partialorder %v1314_v13, 8.507059e+37  ;;  %v1376_v40 = vadd.f32 %v2991_v19, %v1292_v53 }
 0x3c5   :  { %v1357_v6 = vor.u32 1.1754944e-38, %v1356_v3  ;;  %vm1355_vm9 = vcmp.eq.f32.partialorder %v1354_v23, 8.507059e+37 }
 0x3c7   :  { %v2266_v60 = vpop.eup %2265 }
 0x3c8   :  { %v2268_v29 = vpop.eup %2267  ;;  %v1304_v31 = vadd.f32 1.0, %v2266_v60 }
 0x3c9   :  { %v2270_v4 = vpop.eup %2269  ;;  %v1306_v36 = vmul.f32 %v2268_v29, %v1303_v8  ;;  %vm1311_vm0 = vweird.f32 %v2268_v29  ;;  %v3207_v8 = vld [vmem:[#allocation27_spill] sm:$0xff] }
 0x3ca   :  { %v2272_v18 = vpop.eup %2271  ;;  %v1346_v61 = vmul.f32 %v2270_v4, %v1343_v48  ;;  %2273 = vrcp.f32 %v1304_v31  ;;  %vm1312_vm2 = vmor %vm1310_vm1, %vm1311_vm0  ;;  %vm1351_vm4 = vweird.f32 %v2270_v4  ;;  %v1331_v43 = vand.u32 2147483648, %v1304_v31 }
 0x3cb   :  { %v1307_v14 = vsub.f32 1.0, %v1306_v36  ;;  %v2985_v54 = vadd.f32 1.0, %v2272_v18  ;;  %vm2997_vm6 = vmor %vm1350_vm5, %vm1351_vm4  ;;  %v1329_v56 = vand.u32 2147483647, %v1304_v31  ;;  %vm1325_vm8 = vweird.f32 %v1304_v31 }
 0x3cc   :  { %v1347_v11 = vsub.f32 1.0, %v1346_v61  ;;  %v1332_v20 = vor.u32 1.1754944e-38, %v1331_v43  ;;  %v420_v58 = vadd.f32 %v3207_v8, %v2630_v51 }
 0x3cd   :  { %v1308_v0 = vmul.f32 %v2268_v29, %v1307_v14  ;;  %2275 = vrcp.f32 %v2985_v54  ;;  %vm1330_vm11 = vcmp.eq.f32.partialorder %v1329_v56, 8.507059e+37  ;;  %v1371_v48 = vand.u32 2147483648, %v2985_v54 }
 0x3ce   :  { %v1348_v28 = vmul.f32 %v2270_v4, %v1347_v11  ;;  %vm1365_vm13 = vweird.f32 %v2985_v54 }
 0x3cf   :  { %v1309_v62 = vadd.f32 %v2268_v29, %v1308_v0  ;;  %v1372_v11 = vor.u32 1.1754944e-38, %v1371_v48 }
 0x3d0   :  { %v2274_v17 = vpop.eup %2273  ;;  %v1349_v45 = vadd.f32 %v2270_v4, %v1348_v28 }
 0x3d1   :  { %v1313_v32 = vsel %vm1312_vm2, %v2268_v29, %v1309_v62  ;;  %v1321_v37 = vmul.f32 %v2274_v17, %v1304_v31  ;;  %vm1326_vm7 = vweird.f32 %v2274_v17  ;;  %v1369_v31 = vand.u32 2147483647, %v2985_v54 }
 0x3d2   :  { %v1318_v27 = vsel %vm1315_vm3, %v1317_v52, %v1313_v32  ;;  %v1353_v44 = vsel %vm2997_vm6, %v2270_v4, %v1349_v45  ;;  %vm1327_vm10 = vmor %vm1325_vm8, %vm1326_vm7 }
 0x3d3   :  { %v2276_v47 = vpop.eup %2275  ;;  %v1377_v9 = vmul.f32 %v1375_v38, %v1318_v27  ;;  %v1322_v16 = vsub.f32 1.0, %v1321_v37  ;;  %v1358_v2 = vsel %vm1355_vm9, %v1357_v6, %v1353_v44  ;;  %vm1370_vm15 = vcmp.eq.f32.partialorder %v1369_v31, 8.507059e+37 }
 0x3d4   :  { %v1361_v34 = vmul.f32 %v2276_v47, %v2985_v54  ;;  %vm1366_vm12 = vweird.f32 %v2276_v47  ;;  %v1383_v29 = vsub.f32 1.0, %v1358_v2  ;;  %v1387_v14 = vmul.f32 %v1358_v2, %v2938_v46 }
 0x3d5   :  { %v1379_v22 = vadd.f32 %v1377_v9, %v418_v25  ;;  %v1323_v33 = vmul.f32 %v2274_v17, %v1322_v16  ;;  %vm1367_vm14 = vmor %vm1365_vm13, %vm1366_vm12  ;;  %v3211_v25 = vld [vmem:[#allocation15_spill] sm:$0xff] }
 0x3d6   :  { %v1362_v7 = vsub.f32 1.0, %v1361_v34  ;;  %v327_v3 = vadd.f32 %v3211_v25, %v2600_v39 }
 0x3d7   :  { %2277 = vtanh.f32 %v1379_v22  ;;  %v1324_v63 = vadd.f32 %v2274_v17, %v1323_v33 }
 0x3d8   :  { %v1363_v12 = vmul.f32 %v2276_v47, %v1362_v7 }
 0x3d9   :  { %v1328_v55 = vsel %vm1327_vm10, %v2274_v17, %v1324_v63 }
 0x3da   :  { %v1364_v42 = vadd.f32 %v2276_v47, %v1363_v12  ;;  %v1333_v1 = vsel %vm1330_vm11, %v1332_v20, %v1328_v55 }
 0x3db   :  { %v1378_v60 = vmul.f32 %v1376_v40, %v1333_v1 }
 0x3dc   :  { %v1368_v61 = vsel %vm1367_vm14, %v2276_v47, %v1364_v42 }
 0x3dd   :  { %v2278_v4 = vpop.eup %2277  ;;  %v1380_v36 = vadd.f32 %v1378_v60, %v420_v58  ;;  %v1373_v50 = vsel %vm1370_vm15, %v1372_v11, %v1368_v61 }
 0x3de   :  { %v1385_v18 = vmul.f32 %v2278_v4, %v1383_v29  ;;  %v1384_v0 = vsub.f32 1.0, %v1373_v50  ;;  %v1388_v28 = vmul.f32 %v1373_v50, %v2945_v24  ;;  %v3208_v24 = vld [vmem:[#allocation18_spill] sm:$0xff] }
 0x3df   :  { %2279 = vtanh.f32 %v1380_v36  ;;  %v374_v17 = vadd.f32 %v3208_v24, %v2611_v57 }
 0x3e0   :  { %v3010_v41 = vadd.f32 %v1387_v14, %v1385_v18  ;;  %v3212_v14 = vld [vmem:[#allocation28_spill] sm:$0xff] }
 0x3e1   :  { %v423_v11 = vadd.f32 %v3212_v14, %v2630_v51 }
 0x3e2   :  { %2099 = vst [vmem:[%s3167_s5 + $0x40] sm:$0xff] %v3010_v41 }
 0x3e5   :  { %v2280_v54 = vpop.eup %2279 }
 0x3e6   :  { %v1386_v13 = vmul.f32 %v2280_v54, %v1384_v0 }
 0x3e8   :  { %v3017_v62 = vadd.f32 %v1388_v28, %v1386_v13 }
 0x3ea   :  { %2100 = vst [vmem:[%s3167_s5 + $0x48] sm:$0xff] %v3017_v62  ;;  %v1401_v46 = vpack.c.bf16 %v3017_v62, %v3010_v41 }
 0x3ec   :  { %1410 = vmatmul.bf16.vlgmr.msra.gmra.mxu3 %v1401_v46  ;;  %1424 = vmatmul.bf16.vlgmr.msra.gmra.mxu0 %v1401_v46 }
 0x3ed   :  { %1438 = vmatmul.bf16.vlgmr.msra.gmra.mxu1 %v1401_v46  ;;  %1728 = vmatpush.bf16.msra.mxu3 %v2479_v49 }
 0x3f1   :  { %1729 = vmatpush.bf16.msra.mxu3 %v2486_v59  ;;  %v3209_v59 = vld [vmem:[#allocation13_spill] sm:$0xff] }
 0x3f2   :  { %v325_v38 = vadd.f32 %v3209_v59, %v2600_v39 }
 0x3f5   :  { %1730 = vmatpush.bf16.msra.mxu3 %v2494_v5 }
 0x3f9   :  { %1731 = vmatpush.bf16.msra.mxu3 %v2502_v15  ;;  %v3210_v15 = vld [vmem:[#allocation20_spill] sm:$0xff] }
 0x3fd   :  { %1732 = vmatpush.bf16.msra.mxu3 %v2511_v21  ;;  %v376_v21 = vadd.f32 %v3210_v15, %v2611_v57 }
 0x401   :  { %1733 = vmatpush.bf16.msra.mxu3 %v2521_v26 }
 0x405   :  { %1734 = vmatpush.bf16.msra.mxu3 %v2529_v30 }
 0x409   :  { %1735 = vmatpush.bf16.msra.mxu3 %v2535_v35 }
 0x469   :  { %v1425_v52 = vpop.f32.mrf.mxu0 }
 0x46a   :  { %v1484_v32 = vadd.f32 %v1425_v52, %v374_v17  ;;  %v1439_v2 = vpop.f32.mrf.mxu1 }
 0x46b   :  { %v1524_v29 = vadd.f32 %v2991_v19, %v1439_v2  ;;  %v3217_v2 = vld [vmem:[#allocation22_spill] sm:$0xff] }
 0x46c   :  { %v2103_v49 = vmul.f32 -1.442695, %v1484_v32 }
 0x46e   :  { %2281 = vpow2.f32 %v2103_v49 }
 0x46f   :  { %v1411_v5 = vpop.f32.mrf.mxu3 }
 0x470   :  { %v1444_v37 = vadd.f32 %v1411_v5, %v325_v38 }
 0x471   :  { %v1427_v26 = vpop.f32.mrf.mxu0 }
 0x472   :  { %v2101_v45 = vmul.f32 -1.442695, %v1444_v37  ;;  %v1485_v30 = vadd.f32 %v1427_v26, %v376_v21  ;;  %v1441_v49 = vpop.f32.mrf.mxu1 }
 0x473   :  { %v1525_v21 = vadd.f32 %v2991_v19, %v1441_v49 }
 0x474   :  { %v2282_v27 = vpop.eup %2281  ;;  %2283 = vpow2.f32 %v2101_v45  ;;  %v2104_v35 = vmul.f32 -1.442695, %v1485_v30 }
 0x475   :  { %v3039_v47 = vadd.f32 1.0, %v2282_v27  ;;  %v3215_v27 = vld [vmem:[#allocation29_spill] sm:$0xff] }
 0x476   :  { %2285 = vpow2.f32 %v2104_v35  ;;  %v425_v35 = vadd.f32 %v3215_v27, %v2630_v51 }
 0x477   :  { %v1413_v9 = vpop.f32.mrf.mxu3  ;;  %2287 = vrcp.f32 %v3039_v47  ;;  %v1505_v50 = vand.u32 2147483648, %v3039_v47  ;;  %vm1499_vm5 = vweird.f32 %v3039_v47  ;;  %v1503_v13 = vand.u32 2147483647, %v3039_v47 }
 0x478   :  { %v1445_v16 = vadd.f32 %v1413_v9, %v327_v3 }
 0x479   :  { %v1506_v38 = vor.u32 1.1754944e-38, %v1505_v50  ;;  %vm1504_vm9 = vcmp.eq.f32.partialorder %v1503_v13, 8.507059e+37 }
 0x47a   :  { %v2284_v23 = vpop.eup %2283  ;;  %v2102_v34 = vmul.f32 -1.442695, %v1445_v16 }
 0x47b   :  { %v1452_v43 = vadd.f32 1.0, %v2284_v23 }
 0x47c   :  { %v2286_v10 = vpop.eup %2285  ;;  %2289 = vpow2.f32 %v2102_v34 }
 0x47d   :  { %2291 = vrcp.f32 %v1452_v43  ;;  %v2288_v22 = vpop.eup %2287  ;;  %v3044_v33 = vadd.f32 1.0, %v2286_v10  ;;  %v1465_v55 = vand.u32 2147483648, %v1452_v43  ;;  %v1463_v42 = vand.u32 2147483647, %v1452_v43 }
 0x47e   :  { %v1495_v56 = vmul.f32 %v2288_v22, %v3039_v47  ;;  %vm1459_vm1 = vweird.f32 %v1452_v43  ;;  %vm1500_vm4 = vweird.f32 %v2288_v22 }
 0x47f   :  { %2293 = vrcp.f32 %v3044_v33  ;;  %v1466_v60 = vor.u32 1.1754944e-38, %v1465_v55  ;;  %vm1464_vm3 = vcmp.eq.f32.partialorder %v1463_v42, 8.507059e+37  ;;  %vm3058_vm6 = vmor %vm1499_vm5, %vm1500_vm4  ;;  %v1520_v47 = vand.u32 2147483648, %v3044_v33 }
 0x480   :  { %v1496_v63 = vsub.f32 1.0, %v1495_v56  ;;  %vm1514_vm13 = vweird.f32 %v3044_v33  ;;  %v1518_v3 = vand.u32 2147483647, %v3044_v33  ;;  %v379_v55 = vadd.f32 %v3217_v2, %v2611_v57 }
 0x482   :  { %v2290_v44 = vpop.eup %2289  ;;  %v1497_v1 = vmul.f32 %v2288_v22, %v1496_v63  ;;  %vm1519_vm15 = vcmp.eq.f32.partialorder %v1518_v3, 8.507059e+37 }
 0x483   :  { %v2292_v7 = vpop.eup %2291  ;;  %v1453_v53 = vadd.f32 1.0, %v2290_v44 }
 0x484   :  { %v1455_v6 = vmul.f32 %v2292_v7, %v1452_v43  ;;  %vm1460_vm0 = vweird.f32 %v2292_v7  ;;  %v1498_v36 = vadd.f32 %v2288_v22, %v1497_v1 }
 0x485   :  { %2295 = vrcp.f32 %v1453_v53  ;;  %v3048_v12 = vpop.eup %2293  ;;  %vm1461_vm2 = vmor %vm1459_vm1, %vm1460_vm0  ;;  %v1480_v28 = vand.u32 2147483648, %v1453_v53  ;;  %v1478_v17 = vand.u32 2147483647, %v1453_v53  ;;  %vm1474_vm8 = vweird.f32 %v1453_v53 }
 0x486   :  { %v1456_v20 = vsub.f32 1.0, %v1455_v6  ;;  %v1510_v8 = vmul.f32 %v3048_v12, %v3044_v33  ;;  %v1502_v59 = vsel %vm3058_vm6, %v2288_v22, %v1498_v36  ;;  %vm1515_vm12 = vweird.f32 %v3048_v12 }
 0x487   :  { %v1481_v15 = vor.u32 1.1754944e-38, %v1480_v28  ;;  %vm1479_vm11 = vcmp.eq.f32.partialorder %v1478_v17, 8.507059e+37  ;;  %v1507_v26 = vsel %vm1504_vm9, %v1506_v38, %v1502_v59  ;;  %vm1516_vm14 = vmor %vm1514_vm13, %vm1515_vm12  ;;  %v1521_v22 = vor.u32 1.1754944e-38, %v1520_v47 }
 0x488   :  { %v1457_v40 = vmul.f32 %v2292_v7, %v1456_v20  ;;  %v1511_v61 = vsub.f32 1.0, %v1510_v8  ;;  %v1532_v9 = vsub.f32 1.0, %v1507_v26  ;;  %v1536_v10 = vmul.f32 %v1507_v26, %v3010_v41 }
 0x48a   :  { %v1458_v58 = vadd.f32 %v2292_v7, %v1457_v40  ;;  %v1512_v32 = vmul.f32 %v3048_v12, %v1511_v61 }
 0x48b   :  { %v2296_v48 = vpop.eup %2295 }
 0x48c   :  { %v1462_v31 = vsel %vm1461_vm2, %v2292_v7, %v1458_v58  ;;  %v1470_v4 = vmul.f32 %v2296_v48, %v1453_v53  ;;  %vm1475_vm7 = vweird.f32 %v2296_v48  ;;  %v1513_v45 = vadd.f32 %v3048_v12, %v1512_v32 }
 0x48d   :  { %v1467_v18 = vsel %vm1464_vm3, %v1466_v60, %v1462_v31  ;;  %vm1476_vm10 = vmor %vm1474_vm8, %vm1475_vm7 }
 0x48e   :  { %v1526_v0 = vmul.f32 %v1524_v29, %v1467_v18  ;;  %v1471_v54 = vsub.f32 1.0, %v1470_v4  ;;  %v1517_v34 = vsel %vm1516_vm14, %v3048_v12, %v1513_v45  ;;  %v3216_v12 = vld [vmem:[#allocation17_spill] sm:$0xff]  ;;  %v3219_v29 = vld [vmem:[#allocation24_spill] sm:$0xff] }
 0x48f   :  { %v1522_v44 = vsel %vm1519_vm15, %v1521_v22, %v1517_v34  ;;  %v330_v20 = vadd.f32 %v3216_v12, %v2600_v39  ;;  %v381_v31 = vadd.f32 %v3219_v29, %v2611_v57  ;;  %v3220_v34 = vld [vmem:[#allocation30_spill] sm:$0xff] }
 0x490   :  { %v1472_v24 = vmul.f32 %v2296_v48, %v1471_v54  ;;  %v1528_v52 = vadd.f32 %v1526_v0, %v423_v11  ;;  %v1533_v33 = vsub.f32 1.0, %v1522_v44  ;;  %v1537_v6 = vmul.f32 %v1522_v44, %v3017_v62 }
 0x492   :  { %v1473_v5 = vadd.f32 %v2296_v48, %v1472_v24  ;;  %2297 = vtanh.f32 %v1528_v52 }
 0x494   :  { %v1477_v37 = vsel %vm1476_vm10, %v2296_v48, %v1473_v5  ;;  %v3218_v48 = vld [vmem:[#allocation19_spill] sm:$0xff] }
 0x495   :  { %v1482_v30 = vsel %vm1479_vm11, %v1481_v15, %v1477_v37  ;;  %v332_v60 = vadd.f32 %v3218_v48, %v2600_v39 }
 0x496   :  { %v1527_v25 = vmul.f32 %v1525_v21, %v1482_v30 }
 0x498   :  { %v2298_v16 = vpop.eup %2297  ;;  %v1529_v23 = vadd.f32 %v1527_v25, %v425_v35 }
 0x499   :  { %v1534_v43 = vmul.f32 %v2298_v16, %v1532_v9 }
 0x49a   :  { %2299 = vtanh.f32 %v1529_v23 }
 0x49b   :  { %v3075_v56 = vadd.f32 %v1536_v10, %v1534_v43  ;;  %v428_v43 = vadd.f32 %v3220_v34, %v2630_v51 }
 0x49d   :  { %2105 = vst [vmem:[%s3167_s5 + $0x50] sm:$0xff] %v3075_v56 }
 0x4a0   :  { %v2300_v7 = vpop.eup %2299 }
 0x4a1   :  { %v1535_v53 = vmul.f32 %v2300_v7, %v1533_v33 }
 0x4a3   :  { %v3082_v63 = vadd.f32 %v1537_v6, %v1535_v53 }
 0x4a5   :  { %2106 = vst [vmem:[%s3167_s5 + $0x58] sm:$0xff] %v3082_v63  ;;  %v1550_v41 = vpack.c.bf16 %v3082_v63, %v3075_v56 }
 0x4a7   :  { %1559 = vmatmul.bf16.vlgmr.msra.gmra.mxu2 %v1550_v41  ;;  %1573 = vmatmul.bf16.vlgmr.msrb.gmra.mxu3 %v1550_v41 }
 0x4a8   :  { %1587 = vmatmul.bf16.vlgmr.msrb.gmra.mxu0 %v1550_v41 }
 0x525   :  { %v1588_v5 = vpop.f32.mrf.mxu0 }
 0x526   :  { %v1673_v47 = vadd.f32 %v2991_v19, %v1588_v5  ;;  %v3224_v5 = vld [vmem:[#allocation21_spill] sm:$0xff] }
 0x52a   :  { %v1560_v62 = vpop.f32.mrf.mxu2  ;;  %v1574_v40 = vpop.f32.mrf.mxu3 }
 0x52b   :  { %v1593_v42 = vadd.f32 %v1560_v62, %v330_v20  ;;  %v1633_v1 = vadd.f32 %v1574_v40, %v379_v55 }
 0x52d   :  { %v2107_v8 = vmul.f32 -1.442695, %v1593_v42  ;;  %v2109_v58 = vmul.f32 -1.442695, %v1633_v1  ;;  %v1590_v55 = vpop.f32.mrf.mxu0 }
 0x52e   :  { %v1674_v48 = vadd.f32 %v2991_v19, %v1590_v55 }
 0x52f   :  { %2301 = vpow2.f32 %v2107_v8 }
 0x530   :  { %2303 = vpow2.f32 %v2109_v58 }
 0x532   :  { %v1562_v4 = vpop.f32.mrf.mxu2  ;;  %v1576_v36 = vpop.f32.mrf.mxu3 }
 0x533   :  { %v1594_v18 = vadd.f32 %v1562_v4, %v332_v60  ;;  %v1634_v61 = vadd.f32 %v1576_v36, %v381_v31  ;;  %v3223_v4 = vld [vmem:[#allocation31_spill] sm:$0xff] }
 0x534   :  { %v430_v36 = vadd.f32 %v3223_v4, %v2630_v51 }
 0x535   :  { %v2302_v14 = vpop.eup %2301  ;;  %v2108_v11 = vmul.f32 -1.442695, %v1594_v18  ;;  %v2110_v54 = vmul.f32 -1.442695, %v1634_v61 }
 0x536   :  { %v2304_v50 = vpop.eup %2303  ;;  %v1601_v0 = vadd.f32 1.0, %v2302_v14 }
 0x537   :  { %v1641_v13 = vadd.f32 1.0, %v2304_v50  ;;  %2305 = vpow2.f32 %v2108_v11 }
 0x538   :  { %2307 = vrcp.f32 %v1601_v0  ;;  %v1614_v15 = vand.u32 2147483648, %v1601_v0  ;;  %v1612_v26 = vand.u32 2147483647, %v1601_v0  ;;  %vm1608_vm1 = vweird.f32 %v1601_v0 }
 0x539   :  { %2309 = vrcp.f32 %v1641_v13  ;;  %v1654_v22 = vand.u32 2147483648, %v1641_v13  ;;  %vm1648_vm5 = vweird.f32 %v1641_v13  ;;  %v1652_v33 = vand.u32 2147483647, %v1641_v13 }
 0x53a   :  { %2311 = vpow2.f32 %v2110_v54  ;;  %v1615_v35 = vor.u32 1.1754944e-38, %v1614_v15  ;;  %vm1613_vm3 = vcmp.eq.f32.partialorder %v1612_v26, 8.507059e+37  ;;  %v335_v15 = vadd.f32 %v3224_v5, %v2600_v39 }
 0x53b   :  { %v1655_v40 = vor.u32 1.1754944e-38, %v1654_v22  ;;  %vm1653_vm9 = vcmp.eq.f32.partialorder %v1652_v33, 8.507059e+37 }
 0x53d   :  { %v2306_v28 = vpop.eup %2305 }
 0x53e   :  { %v2308_v46 = vpop.eup %2307  ;;  %v1602_v24 = vadd.f32 1.0, %v2306_v28 }
 0x53f   :  { %v2310_v17 = vpop.eup %2309  ;;  %v1604_v52 = vmul.f32 %v2308_v46, %v1601_v0  ;;  %vm1609_vm0 = vweird.f32 %v2308_v46 }
 0x540   :  { %v2312_v32 = vpop.eup %2311  ;;  %v1644_v49 = vmul.f32 %v2310_v17, %v1641_v13  ;;  %2313 = vrcp.f32 %v1602_v24  ;;  %vm1610_vm2 = vmor %vm1608_vm1, %vm1609_vm0  ;;  %vm1649_vm4 = vweird.f32 %v2310_v17  ;;  %v1629_v7 = vand.u32 2147483648, %v1602_v24 }
 0x541   :  { %v1605_v59 = vsub.f32 1.0, %v1604_v52  ;;  %v3098_v38 = vadd.f32 1.0, %v2312_v32  ;;  %vm3105_vm6 = vmor %vm1648_vm5, %vm1649_vm4  ;;  %v1627_v20 = vand.u32 2147483647, %v1602_v24  ;;  %vm1623_vm8 = vweird.f32 %v1602_v24 }
 0x542   :  { %v1645_v21 = vsub.f32 1.0, %v1644_v49  ;;  %v1630_v1 = vor.u32 1.1754944e-38, %v1629_v7 }
 0x543   :  { %v1606_v37 = vmul.f32 %v2308_v46, %v1605_v59  ;;  %2315 = vrcp.f32 %v3098_v38  ;;  %vm1628_vm11 = vcmp.eq.f32.partialorder %v1627_v20, 8.507059e+37  ;;  %v1669_v61 = vand.u32 2147483648, %v3098_v38 }
 0x544   :  { %v1646_v45 = vmul.f32 %v2310_v17, %v1645_v21  ;;  %vm1663_vm13 = vweird.f32 %v3098_v38  ;;  %v1667_v11 = vand.u32 2147483647, %v3098_v38 }
 0x545   :  { %v1607_v30 = vadd.f32 %v2308_v46, %v1606_v37 }
 0x546   :  { %v2314_v27 = vpop.eup %2313  ;;  %v1647_v16 = vadd.f32 %v2310_v17, %v1646_v45  ;;  %vm1668_vm15 = vcmp.eq.f32.partialorder %v1667_v11, 8.507059e+37 }
 0x547   :  { %v1611_v25 = vsel %vm1610_vm2, %v2308_v46, %v1607_v30  ;;  %v1619_v3 = vmul.f32 %v2314_v27, %v1602_v24  ;;  %vm1624_vm7 = vweird.f32 %v2314_v27  ;;  %v1670_v46 = vor.u32 1.1754944e-38, %v1669_v61 }
 0x548   :  { %v1616_v9 = vsel %vm1613_vm3, %v1615_v35, %v1611_v25  ;;  %v1651_v2 = vsel %vm3105_vm6, %v2310_v17, %v1647_v16  ;;  %vm1625_vm10 = vmor %vm1623_vm8, %vm1624_vm7 }
 0x549   :  { %v2316_v23 = vpop.eup %2315  ;;  %v1675_v10 = vmul.f32 %v1673_v47, %v1616_v9  ;;  %v1620_v44 = vsub.f32 1.0, %v1619_v3  ;;  %v1656_v58 = vsel %vm1653_vm9, %v1655_v40, %v1651_v2 }
 0x54a   :  { %v1659_v53 = vmul.f32 %v2316_v23, %v3098_v38  ;;  %vm1664_vm12 = vweird.f32 %v2316_v23  ;;  %v1681_v14 = vsub.f32 1.0, %v1656_v58  ;;  %v1685_v28 = vmul.f32 %v1656_v58, %v3075_v56 }
 0x54b   :  { %v1677_v6 = vadd.f32 %v1675_v10, %v428_v43  ;;  %v1621_v12 = vmul.f32 %v2314_v27, %v1620_v44  ;;  %vm1665_vm14 = vmor %vm1663_vm13, %vm1664_vm12  ;;  %v3227_v43 = vld [vmem:[#allocation26_spill] sm:$0xff] }
 0x54c   :  { %v1660_v62 = vsub.f32 1.0, %v1659_v53  ;;  %v386_v10 = vadd.f32 %v3227_v43, %v2611_v57 }
 0x54d   :  { %2317 = vtanh.f32 %v1677_v6  ;;  %v1622_v42 = vadd.f32 %v2314_v27, %v1621_v12 }
 0x54e   :  { %v1661_v8 = vmul.f32 %v2316_v23, %v1660_v62 }
 0x54f   :  { %v1626_v60 = vsel %vm1625_vm10, %v2314_v27, %v1622_v42  ;;  %v3226_v27 = vld [vmem:[#allocation23_spill] sm:$0xff] }
 0x550   :  { %v1631_v29 = vsel %vm1628_vm11, %v1630_v1, %v1626_v60  ;;  %v1662_v31 = vadd.f32 %v2316_v23, %v1661_v8  ;;  %v337_v35 = vadd.f32 %v3226_v27, %v2600_v39 }
 0x551   :  { %v1676_v18 = vmul.f32 %v1674_v48, %v1631_v29 }
 0x552   :  { %v1666_v54 = vsel %vm1665_vm14, %v2316_v23, %v1662_v31 }
 0x553   :  { %v2318_v50 = vpop.eup %2317  ;;  %v1678_v0 = vadd.f32 %v1676_v18, %v430_v36  ;;  %v1671_v17 = vsel %vm1668_vm15, %v1670_v46, %v1666_v54  ;;  %v3228_v36 = vld [vmem:[#allocation32_spill] sm:$0xff] }
 0x554   :  { %v1683_v13 = vmul.f32 %v2318_v50, %v1681_v14  ;;  %v1682_v52 = vsub.f32 1.0, %v1671_v17  ;;  %v1686_v59 = vmul.f32 %v1671_v17, %v3082_v63  ;;  %v3225_v63 = vld [vmem:[#allocation25_spill] sm:$0xff]  ;;  %v433_v18 = vadd.f32 %v3228_v36, %v2630_v51 }
 0x555   :  { %2319 = vtanh.f32 %v1678_v0  ;;  %v384_v45 = vadd.f32 %v3225_v63, %v2611_v57 }
 0x556   :  { %v3118_v24 = vadd.f32 %v1685_v28, %v1683_v13 }
 0x558   :  { %2111 = vst [vmem:[%s3167_s5 + $0x60] sm:$0xff] %v3118_v24 }
 0x55b   :  { %v2320_v32 = vpop.eup %2319 }
 0x55c   :  { %v1684_v49 = vmul.f32 %v2320_v32, %v1682_v52 }
 0x55e   :  { %v3125_v38 = vadd.f32 %v1686_v59, %v1684_v49 }
 0x560   :  { %2112 = vst [vmem:[%s3167_s5 + $0x68] sm:$0xff] %v3125_v38  ;;  %v1699_v56 = vpack.c.bf16 %v3125_v38, %v3118_v24 }
 0x562   :  { %1708 = vmatmul.bf16.vlgmr.msrb.gmra.mxu1 %v1699_v56  ;;  %1722 = vmatmul.bf16.vlgmr.msrb.gmra.mxu2 %v1699_v56 }
 0x563   :  { %1736 = vmatmul.bf16.vlgmr.msra.gmra.mxu3 %v1699_v56 }
 0x5df   :  { %v1709_v21 = vpop.f32.mrf.mxu1 }
 0x5e0   :  { %v1742_v37 = vadd.f32 %v1709_v21, %v335_v15 }
 0x5e2   :  { %v2113_v26 = vmul.f32 -1.442695, %v1742_v37 }
 0x5e4   :  { %2321 = vpow2.f32 %v2113_v26 }
 0x5e5   :  { %v1723_v30 = vpop.f32.mrf.mxu2 }
 0x5e6   :  { %v1782_v47 = vadd.f32 %v1723_v30, %v384_v45  ;;  %v1737_v62 = vpop.f32.mrf.mxu3 }
 0x5e7   :  { %v1711_v25 = vpop.f32.mrf.mxu1  ;;  %v1822_v4 = vadd.f32 %v2991_v19, %v1737_v62 }
 0x5e8   :  { %v2115_v3 = vmul.f32 -1.442695, %v1782_v47  ;;  %v1743_v9 = vadd.f32 %v1711_v25, %v337_v35  ;;  %v3229_v47 = vld [vmem:[#allocation33_spill] sm:$0xff] }
 0x5e9   :  { %v435_v25 = vadd.f32 %v3229_v47, %v2630_v51 }
 0x5ea   :  { %v2322_v16 = vpop.eup %2321  ;;  %2323 = vpow2.f32 %v2115_v3  ;;  %v2114_v23 = vmul.f32 -1.442695, %v1743_v9 }
 0x5eb   :  { %v1750_v34 = vadd.f32 1.0, %v2322_v16 }
 0x5ec   :  { %2325 = vpow2.f32 %v2114_v23 }
 0x5ed   :  { %2327 = vrcp.f32 %v1750_v34  ;;  %v1725_v22 = vpop.f32.mrf.mxu2  ;;  %v1763_v2 = vand.u32 2147483648, %v1750_v34  ;;  %v1761_v57 = vand.u32 2147483647, %v1750_v34  ;;  %vm1757_vm1 = vweird.f32 %v1750_v34 }
 0x5ee   :  { %v1783_v44 = vadd.f32 %v1725_v22, %v386_v10  ;;  %v1739_v15 = vpop.f32.mrf.mxu3 }
 0x5ef   :  { %v1764_v48 = vor.u32 1.1754944e-38, %v1763_v2  ;;  %vm1762_vm3 = vcmp.eq.f32.partialorder %v1761_v57, 8.507059e+37  ;;  %v1823_v30 = vadd.f32 %v2991_v19, %v1739_v15 }
 0x5f0   :  { %v2324_v33 = vpop.eup %2323  ;;  %v2116_v7 = vmul.f32 -1.442695, %v1783_v44 }
 0x5f1   :  { %v1790_v53 = vadd.f32 1.0, %v2324_v33 }
 0x5f2   :  { %v2326_v6 = vpop.eup %2325  ;;  %2329 = vpow2.f32 %v2116_v7 }
 0x5f3   :  { %v2328_v39 = vpop.eup %2327  ;;  %2331 = vrcp.f32 %v1790_v53  ;;  %v1751_v12 = vadd.f32 1.0, %v2326_v6  ;;  %v1803_v50 = vand.u32 2147483648, %v1790_v53  ;;  %v1801_v54 = vand.u32 2147483647, %v1790_v53 }
 0x5f4   :  { %v1753_v41 = vmul.f32 %v2328_v39, %v1750_v34  ;;  %vm1758_vm0 = vweird.f32 %v2328_v39  ;;  %vm1797_vm5 = vweird.f32 %v1790_v53 }
 0x5f5   :  { %2333 = vrcp.f32 %v1751_v12  ;;  %vm1759_vm2 = vmor %vm1757_vm1, %vm1758_vm0  ;;  %v1778_v17 = vand.u32 2147483648, %v1751_v12  ;;  %v1776_v49 = vand.u32 2147483647, %v1751_v12  ;;  %v1804_v59 = vor.u32 1.1754944e-38, %v1803_v50 }
 0x5f6   :  { %v1754_v20 = vsub.f32 1.0, %v1753_v41  ;;  %vm1802_vm8 = vcmp.eq.f32.partialorder %v1801_v54, 8.507059e+37  ;;  %vm1772_vm9 = vweird.f32 %v1751_v12 }
 0x5f7   :  { %v1779_v63 = vor.u32 1.1754944e-38, %v1778_v17  ;;  %vm1777_vm11 = vcmp.eq.f32.partialorder %v1776_v49, 8.507059e+37 }
 0x5f8   :  { %v2330_v55 = vpop.eup %2329  ;;  %v1755_v40 = vmul.f32 %v2328_v39, %v1754_v20 }
 0x5f9   :  { %v2332_v42 = vpop.eup %2331  ;;  %v3141_v1 = vadd.f32 1.0, %v2330_v55 }
 0x5fa   :  { %v1793_v8 = vmul.f32 %v2332_v42, %v1790_v53  ;;  %v1756_v58 = vadd.f32 %v2328_v39, %v1755_v40  ;;  %vm1798_vm4 = vweird.f32 %v2332_v42 }
 0x5fb   :  { %2335 = vrcp.f32 %v3141_v1  ;;  %v2334_v60 = vpop.eup %2333  ;;  %vm1799_vm6 = vmor %vm1797_vm5, %vm1798_vm4  ;;  %v1818_v9 = vand.u32 2147483648, %v3141_v1  ;;  %vm1812_vm13 = vweird.f32 %v3141_v1  ;;  %v1816_v43 = vand.u32 2147483647, %v3141_v1 }
 0x5fc   :  { %v1794_v29 = vsub.f32 1.0, %v1793_v8  ;;  %v1760_v31 = vsel %vm1759_vm2, %v2328_v39, %v1756_v58  ;;  %v1768_v14 = vmul.f32 %v2334_v60, %v1751_v12  ;;  %vm1773_vm7 = vweird.f32 %v2334_v60 }
 0x5fd   :  { %v1765_v61 = vsel %vm1762_vm3, %v1764_v48, %v1760_v31  ;;  %vm1774_vm10 = vmor %vm1772_vm9, %vm1773_vm7  ;;  %v1819_v7 = vor.u32 1.1754944e-38, %v1818_v9  ;;  %vm1817_vm15 = vcmp.eq.f32.partialorder %v1816_v43, 8.507059e+37 }
 0x5fe   :  { %v1795_v11 = vmul.f32 %v2332_v42, %v1794_v29  ;;  %v1824_v0 = vmul.f32 %v1822_v4, %v1765_v61  ;;  %v1769_v13 = vsub.f32 1.0, %v1768_v14 }
 0x600   :  { %v1796_v28 = vadd.f32 %v2332_v42, %v1795_v11  ;;  %v1826_v46 = vadd.f32 %v1824_v0, %v433_v18  ;;  %v1770_v32 = vmul.f32 %v2334_v60, %v1769_v13 }
 0x601   :  { %v2336_v52 = vpop.eup %2335 }
 0x602   :  { %v1800_v56 = vsel %vm1799_vm6, %v2332_v42, %v1796_v28  ;;  %2337 = vtanh.f32 %v1826_v46  ;;  %v1808_v5 = vmul.f32 %v2336_v52, %v3141_v1  ;;  %v1771_v21 = vadd.f32 %v2334_v60, %v1770_v32 }
 0x603   :  { %v1805_v37 = vsel %vm1802_vm8, %v1804_v59, %v1800_v56  ;;  %vm1813_vm12 = vweird.f32 %v2336_v52 }
 0x604   :  { %v1809_v26 = vsub.f32 1.0, %v1808_v5  ;;  %v1775_v45 = vsel %vm1774_vm10, %v2334_v60, %v1771_v21  ;;  %v1830_v3 = vsub.f32 1.0, %v1805_v37  ;;  %v1834_v22 = vmul.f32 %v1805_v37, %v3118_v24  ;;  %vm1814_vm14 = vmor %vm1812_vm13, %vm1813_vm12 }
 0x605   :  { %v1780_v35 = vsel %vm1777_vm11, %v1779_v63, %v1775_v45 }
 0x606   :  { %v1810_v27 = vmul.f32 %v2336_v52, %v1809_v26  ;;  %v1825_v16 = vmul.f32 %v1823_v30, %v1780_v35 }
 0x608   :  { %v2338_v23 = vpop.eup %2337  ;;  %v1811_v34 = vadd.f32 %v2336_v52, %v1810_v27  ;;  %v1827_v19 = vadd.f32 %v1825_v16, %v435_v25 }
 0x609   :  { %v1832_v10 = vmul.f32 %v2338_v23, %v1830_v3 }
 0x60a   :  { %v1815_v44 = vsel %vm1814_vm14, %v2336_v52, %v1811_v34  ;;  %2339 = vtanh.f32 %v1827_v19 }
 0x60b   :  { %v1836_v33 = vadd.f32 %v1834_v22, %v1832_v10  ;;  %v1820_v51 = vsel %vm1817_vm15, %v1819_v7, %v1815_v44 }
 0x60c   :  { %v1831_v53 = vsub.f32 1.0, %v1820_v51  ;;  %v1835_v41 = vmul.f32 %v1820_v51, %v3125_v38 }
 0x60d   :  { %2117 = vst [vmem:[%s3167_s5 + $0x70] sm:$0xff] %v1836_v33 }
 0x610   :  { %v2340_v6 = vpop.eup %2339 }
 0x611   :  { %v1833_v39 = vmul.f32 %v2340_v6, %v1831_v53 }
 0x613   :  { %v1837_v12 = vadd.f32 %v1835_v41, %v1833_v39 }
 0x615   :  { %2118 = vst [vmem:[%s3167_s5 + $0x78] sm:$0xff] %v1837_v12 }
 0x616   :  { %1847 = vsyncpa [#allocation5], 1 }
 0x617   :  { %1848 = vsyncpa [#allocation7], 1 }

</bundles_post_ra>
